<compile_context>
chip_gen: v6e
topology: v6e:2x2x1
jax: 0.10.0
libtpu: 0.0.40
codegen_flags: <defaults>
</compile_context>

<pallas_src>
import functools
import math

import numpy as np
import jax
import jax.numpy as jnp
from jax.experimental import pallas as pl
from jax.experimental.pallas import tpu as pltpu

EPS = 1e-5


def _round_up(x, m):
    return ((x + m - 1) // m) * m


# ----------------------------------------------------------------------------
# Fused Pallas kernel: encoders -> L x PNA layer -> graph readout -> MLP head
# ----------------------------------------------------------------------------
def _fused_pna_kernel(
    # graph / feature inputs
    h_oh_ref, atom_tbl_ref, e_oh_ref, bond_tbl_ref,
    ends_oh_ref, dst_sc_ref, sel_ref, deg_ref, snorm_ref,
    # PNA layer weights (stacked over layers; K padded to lane multiples)
    pre_w_ref, pre_b_ref, post_w_ref, post_b_ref, mix_w_ref, mix_b_ref,
    # MLPReadout weights
    ro_w0_ref, ro_b0_ref, ro_w1_ref, ro_b1_ref, ro_w2_ref, ro_b2_ref,
    # output
    out_ref,
    # VMEM scratch slabs (lane-dense, zero padded)
    z2_scr, hcat_scr, ro_scr,
    *, n_layers, dmax, avg_d, n_graphs, n_per_graph):
    f32 = jnp.float32
    big = f32(1e30)

    # Zero the padded scratch slabs once, so the zero rows of the padded weight
    # matrices never multiply uninitialised VMEM garbage (NaN * 0 = NaN).
    z2_scr[...] = jnp.zeros_like(z2_scr)
    hcat_scr[...] = jnp.zeros_like(hcat_scr)
    ro_scr[...] = jnp.zeros_like(ro_scr)

    # AtomEncoder / BondEncoder: sum of per-feature embedding lookups expressed
    # as a single one-hot matmul against the stacked tables (MXU, exact).
    h = jnp.dot(h_oh_ref[...], atom_tbl_ref[...], preferred_element_type=f32)   # (N, H)
    e = jnp.dot(e_oh_ref[...], bond_tbl_ref[...], preferred_element_type=f32)   # (E, EH)
    # in_feat_dropout / dropout / batch-norm: identity in eval mode.

    n_nodes, hdim = h.shape
    n_edges = e.shape[0]
    ends_oh = ends_oh_ref[...]        # (2E, N) stacked one-hot: [src rows ; dst rows]
    dst_sc = dst_sc_ref[...]          # (N, E) scatter-add matrix (dst one-hot ^T)
    sel = sel_ref[...]                # (DMAX*N, E) per-neighbor-slot selectors
    deg = deg_ref[...]                # (N, 1) in-degree
    snorm = snorm_ref[...]            # (N, 1) graph-norm factor

    # Degree-dependent factors, shared by every layer; guarded for deg == 0.
    inv_deg = pl.reciprocal(jnp.maximum(deg, f32(1.0)), approx=True)
    logd = jnp.log(deg + f32(1.0))
    amp_scale = logd * f32(1.0 / avg_d)                                          # amplification
    att_scale = f32(avg_d) * pl.reciprocal(jnp.maximum(logd, f32(EPS)), approx=True)  # attenuation
    has_nb = deg > f32(0.0)

    # Edge features are layer-invariant: write them into the z2 slab once.
    z2_scr[:, 2 * hdim:2 * hdim + e.shape[1]] = e

    for l in range(n_layers):
        h_in = h

        # ---- pretrans over edges: msg = [h[src] | h[dst] | e] @ W_pre + b ----
        # One stacked gather matmul produces [h[src]; h[dst]] in a single MXU push.
        he = jnp.dot(ends_oh, h, preferred_element_type=f32)                 # (2E, H)
        z2_scr[:, 0:hdim] = he[:n_edges]                                     # h[src]
        z2_scr[:, hdim:2 * hdim] = he[n_edges:]                              # h[dst]
        msg = jnp.dot(z2_scr[...], pre_w_ref[l], preferred_element_type=f32) + pre_b_ref[l]

        # ---- PNA aggregation [mean, max, min, std] ----
        msum = jnp.dot(dst_sc, msg, preferred_element_type=f32)              # scatter-add
        msumsq = jnp.dot(dst_sc, msg * msg, preferred_element_type=f32)
        # All DMAX slot gathers in one matmul, then sublane-aligned value slices.
        g_all = jnp.dot(sel, msg, preferred_element_type=f32)                # (DMAX*N, H)
        agg_max = jnp.full((n_nodes, hdim), -big, f32)
        agg_min = jnp.full((n_nodes, hdim), big, f32)
        for d in range(dmax):  # unrolled over neighbor slots: pure (N, H) VPU work
            g_d = g_all[d * n_nodes:(d + 1) * n_nodes]
            valid = deg > f32(d)
            agg_max = jnp.maximum(agg_max, jnp.where(valid, g_d, -big))
            agg_min = jnp.minimum(agg_min, jnp.where(valid, g_d, big))
        agg_max = jnp.where(has_nb, agg_max, f32(0.0))   # empty-neighborhood guard
        agg_min = jnp.where(has_nb, agg_min, f32(0.0))
        mean = msum * inv_deg
        var = jnp.maximum(msumsq * inv_deg - mean * mean, f32(0.0))          # torch.relu
        std = jnp.sqrt(var + f32(EPS))

        # ---- [h | agg | amp*agg | att*agg] built by slice writes (no concat) ----
        hcat_scr[:, 0:hdim] = h
        for j, piece in enumerate((mean, agg_max, agg_min, std)):
            hcat_scr[:, (1 + j) * hdim:(2 + j) * hdim] = piece               # identity
            hcat_scr[:, (5 + j) * hdim:(6 + j) * hdim] = piece * amp_scale   # amplification
            hcat_scr[:, (9 + j) * hdim:(10 + j) * hdim] = piece * att_scale  # attenuation

        # ---- posttrans + graph_norm + mixing (LeakyReLU) + residual ----
        h_post = jnp.dot(hcat_scr[...], post_w_ref[l], preferred_element_type=f32) + post_b_ref[l]
        h_post = h_post * snorm
        h_mix = jnp.dot(h_post, mix_w_ref[l], preferred_element_type=f32) + mix_b_ref[l]
        h_mix = jnp.where(h_mix >= f32(0.0), h_mix, f32(0.01) * h_mix)       # LeakyReLU(0.01)
        h = h_in + h_mix                                                     # residual

    # ---- graph readout ['sum','mean','max']; nodes are contiguous per graph ----
    inv_npg = f32(1.0 / n_per_graph)
    for g in range(n_graphs):
        hg = h[g * n_per_graph:(g + 1) * n_per_graph, :]
        s = jnp.sum(hg, axis=0, keepdims=True)
        mx = jnp.max(hg, axis=0, keepdims=True)
        ro_scr[g:g + 1, 0:hdim] = s
        ro_scr[g:g + 1, hdim:2 * hdim] = s * inv_npg
        ro_scr[g:g + 1, 2 * hdim:3 * hdim] = mx

    # ---- MLPReadout (L = 2): Linear+ReLU, Linear+ReLU, Linear ----
    y = jnp.dot(ro_scr[...], ro_w0_ref[...], preferred_element_type=f32) + ro_b0_ref[...]
    y = jnp.maximum(y, f32(0.0))
    y = jnp.dot(y, ro_w1_ref[...], preferred_element_type=f32) + ro_b1_ref[...]
    y = jnp.maximum(y, f32(0.0))
    out_ref[...] = jnp.dot(y, ro_w2_ref[...], preferred_element_type=f32) + ro_b2_ref[...]


# ----------------------------------------------------------------------------
# Wrapper: one pallas_call for the whole forward pass
# ----------------------------------------------------------------------------
_VMEM = pl.BlockSpec(memory_space=pltpu.MemorySpace.VMEM)


def pna_forward(params, h_oh, e_oh, ends_oh, dst_sc, sel, deg, snorm,
                *, avg_d, num_graphs, nodes_per_graph, dmax):
    n_layers = params["pre_w"].shape[0]
    n_nodes = h_oh.shape[0]
    n_edges = e_oh.shape[0]
    pre_pad = params["pre_w"].shape[1]       # 128  (z2 slab width)
    post_pad = params["post_w"].shape[1]     # 512  (h_cat slab width)
    ro_pad = params["ro_w0"].shape[0]        # 128  (readout slab width)
    target_dim = params["ro_w2"].shape[1]

    kernel = functools.partial(
        _fused_pna_kernel, n_layers=n_layers, dmax=dmax, avg_d=float(avg_d),
        n_graphs=num_graphs, n_per_graph=nodes_per_graph)

    return pl.pallas_call(
        kernel,
        out_shape=jax.ShapeDtypeStruct((num_graphs, target_dim), jnp.float32),
        in_specs=[_VMEM] * 21,
        out_specs=_VMEM,
        scratch_shapes=[
            pltpu.VMEM((n_edges, pre_pad), jnp.float32),    # z2 = [h_src|h_dst|e|pad]
            pltpu.VMEM((n_nodes, post_pad), jnp.float32),   # [h | 12 aggregations | pad]
            pltpu.VMEM((num_graphs, ro_pad), jnp.float32),  # [sum | mean | max | pad]
        ],
    )(h_oh, params["atom_tbl"], e_oh, params["bond_tbl"],
      ends_oh, dst_sc, sel, deg, snorm,
      params["pre_w"], params["pre_b"], params["post_w"], params["post_b"],
      params["mix_w"], params["mix_b"],
      params["ro_w0"], params["ro_b0"], params["ro_w1"], params["ro_b1"],
      params["ro_w2"], params["ro_b2"])


# ----------------------------------------------------------------------------
# Parameter init (deterministic, synthetic; weights pre-padded / stacked)
# ----------------------------------------------------------------------------
def _dense_init(key, fan_in, fan_out):
    k1, k2 = jax.random.split(key)
    w = jax.random.normal(k1, (fan_in, fan_out), jnp.float32) / math.sqrt(fan_in)
    b = jax.random.normal(k2, (fan_out,), jnp.float32) * 0.01
    return w, b


def init_params(key, *, hidden=32, edge_hidden=16, n_layers=2, target_dim=4,
                atom_vocabs=(10, 6, 4), bond_vocabs=(5, 3),
                n_agg=4, n_scal=3, n_readout=3):
    keys = iter(jax.random.split(key, 64))
    params = {}
    # AtomEncoder / BondEncoder: per-feature tables stacked so that
    # sum-of-lookups == concat(one_hot) @ stacked_table (done in-kernel).
    params["atom_tbl"] = jnp.concatenate(
        [jax.random.normal(next(keys), (v, hidden), jnp.float32) * 0.1 for v in atom_vocabs], axis=0)
    params["bond_tbl"] = jnp.concatenate(
        [jax.random.normal(next(keys), (v, edge_hidden), jnp.float32) * 0.1 for v in bond_vocabs], axis=0)

    pre_in = 2 * hidden + edge_hidden               # 80  (edge_feat=True, use_3d=False)
    post_in = (n_agg * n_scal + 1) * hidden         # 416 (13 * hidden)
    pre_pad = _round_up(pre_in, 128)                # 128 -> lane-dense matmul K
    post_pad = _round_up(post_in, 128)              # 512
    pre_w, pre_b, post_w, post_b, mix_w, mix_b = [], [], [], [], [], []
    for _ in range(n_layers):
        w, b = _dense_init(next(keys), pre_in, hidden)
        pre_w.append(jnp.pad(w, ((0, pre_pad - pre_in), (0, 0))))
        pre_b.append(b.reshape(1, hidden))
        w, b = _dense_init(next(keys), post_in, hidden)
        post_w.append(jnp.pad(w, ((0, post_pad - post_in), (0, 0))))
        post_b.append(b.reshape(1, hidden))
        w, b = _dense_init(next(keys), hidden, hidden)
        mix_w.append(w)
        mix_b.append(b.reshape(1, hidden))
    params["pre_w"] = jnp.stack(pre_w);  params["pre_b"] = jnp.stack(pre_b)
    params["post_w"] = jnp.stack(post_w); params["post_b"] = jnp.stack(post_b)
    params["mix_w"] = jnp.stack(mix_w);  params["mix_b"] = jnp.stack(mix_b)

    # MLPReadout(last_layer_dim * n_readout, target_dim, L=2)
    ro_in = hidden * n_readout                      # 96
    ro_pad = _round_up(ro_in, 128)                  # 128
    w, b = _dense_init(next(keys), ro_in, ro_in // 2)
    params["ro_w0"] = jnp.pad(w, ((0, ro_pad - ro_in), (0, 0))); params["ro_b0"] = b.reshape(1, -1)
    w, b = _dense_init(next(keys), ro_in // 2, ro_in // 4)
    params["ro_w1"] = w; params["ro_b1"] = b.reshape(1, -1)
    w, b = _dense_init(next(keys), ro_in // 4, target_dim)
    params["ro_w2"] = w; params["ro_b2"] = b.reshape(1, -1)
    return params


# ----------------------------------------------------------------------------
# Main
# ----------------------------------------------------------------------------
if __name__ == "__main__":
    HIDDEN, EDGE_HIDDEN, TARGET_DIM = 32, 16, 4
    NUM_GRAPHS, NODES_PER_GRAPH = 2, 8
    N = NUM_GRAPHS * NODES_PER_GRAPH
    ATOM_VOCABS, BOND_VOCABS = (10, 6, 4), (5, 3)

    # Two bidirectional ring graphs (every node has in-degree 2), contiguous ids.
    src_list, dst_list = [], []
    for g in range(NUM_GRAPHS):
        off = g * NODES_PER_GRAPH
        for i in range(NODES_PER_GRAPH):
            j = (i + 1) % NODES_PER_GRAPH
            src_list += [off + i, off + j]
            dst_list += [off + j, off + i]
    src_np = np.asarray(src_list, np.int32)
    dst_np = np.asarray(dst_list, np.int32)
    E = src_np.shape[0]
    DMAX = 2

    # Gather / scatter structure as one-hot selection matrices (MXU-friendly).
    src_oh = np.zeros((E, N), np.float32); src_oh[np.arange(E), src_np] = 1.0
    dst_oh = np.zeros((E, N), np.float32); dst_oh[np.arange(E), dst_np] = 1.0
    ends_oh = np.concatenate([src_oh, dst_oh], axis=0)   # (2E, N): stacked gather
    dst_sc = np.ascontiguousarray(dst_oh.T)              # (N, E) scatter-add matrix
    sel = np.zeros((DMAX * N, E), np.float32)            # per-neighbor-slot selectors
    fill = np.zeros(N, np.int32)
    for eidx in range(E):
        d = int(dst_np[eidx])
        sel[fill[d] * N + d, eidx] = 1.0
        fill[d] += 1
    deg = fill.astype(np.float32).reshape(N, 1)
    snorm = np.full((N, 1), 1.0 / math.sqrt(NODES_PER_GRAPH), np.float32)
    avg_d = float(np.mean(np.log(deg + 1.0)))            # PNA degree statistic

    key = jax.random.PRNGKey(0)
    k_params, k_h0, k_h1, k_h2, k_e0, k_e1 = jax.random.split(key, 6)
    params = init_params(k_params, hidden=HIDDEN, edge_hidden=EDGE_HIDDEN,
                         n_layers=2, target_dim=TARGET_DIM,
                         atom_vocabs=ATOM_VOCABS, bond_vocabs=BOND_VOCABS)

    h_int = jnp.stack([jax.random.randint(k_h0, (N,), 0, 10),
                       jax.random.randint(k_h1, (N,), 0, 6),
                       jax.random.randint(k_h2, (N,), 0, 4)], axis=1).astype(jnp.int32)
    e_int = jnp.stack([jax.random.randint(k_e0, (E,), 0, 5),
                       jax.random.randint(k_e1, (E,), 0, 3)], axis=1).astype(jnp.int32)

    # Categorical features as concatenated one-hots; the embedding lookup itself
    # happens in-kernel as a single matmul against the stacked tables.
    h_oh = jnp.concatenate([jax.nn.one_hot(h_int[:, i], v, dtype=jnp.float32)
                            for i, v in enumerate(ATOM_VOCABS)], axis=1)
    e_oh = jnp.concatenate([jax.nn.one_hot(e_int[:, i], v, dtype=jnp.float32)
                            for i, v in enumerate(BOND_VOCABS)], axis=1)

    fwd = jax.jit(functools.partial(pna_forward, avg_d=avg_d,
                                    num_graphs=NUM_GRAPHS,
                                    nodes_per_graph=NODES_PER_GRAPH, dmax=DMAX))
    out = fwd(params, h_oh, e_oh, jnp.asarray(ends_oh), jnp.asarray(dst_sc),
              jnp.asarray(sel), jnp.asarray(deg), jnp.asarray(snorm))
    out = jax.block_until_ready(out)

    assert out.shape == (NUM_GRAPHS, TARGET_DIM), out.shape
    assert bool(jnp.all(jnp.isfinite(out)))
    print("KERNEL_OK")
</pallas_src>

<mosaic_0001>
module attributes {stable_mosaic.version = 11 : i64} {
  func.func @_fused_pna_kernel(%arg0: memref<16x20xf32, #tpu.memory_space<vmem>>, %arg1: memref<20x32xf32, #tpu.memory_space<vmem>>, %arg2: memref<32x8xf32, #tpu.memory_space<vmem>>, %arg3: memref<8x16xf32, #tpu.memory_space<vmem>>, %arg4: memref<64x16xf32, #tpu.memory_space<vmem>>, %arg5: memref<16x32xf32, #tpu.memory_space<vmem>>, %arg6: memref<32x32xf32, #tpu.memory_space<vmem>>, %arg7: memref<16x1xf32, #tpu.memory_space<vmem>>, %arg8: memref<16x1xf32, #tpu.memory_space<vmem>>, %arg9: memref<2x128x32xf32, #tpu.memory_space<vmem>>, %arg10: memref<2x1x32xf32, #tpu.memory_space<vmem>>, %arg11: memref<2x512x32xf32, #tpu.memory_space<vmem>>, %arg12: memref<2x1x32xf32, #tpu.memory_space<vmem>>, %arg13: memref<2x32x32xf32, #tpu.memory_space<vmem>>, %arg14: memref<2x1x32xf32, #tpu.memory_space<vmem>>, %arg15: memref<128x48xf32, #tpu.memory_space<vmem>>, %arg16: memref<1x48xf32, #tpu.memory_space<vmem>>, %arg17: memref<48x24xf32, #tpu.memory_space<vmem>>, %arg18: memref<1x24xf32, #tpu.memory_space<vmem>>, %arg19: memref<24x4xf32, #tpu.memory_space<vmem>>, %arg20: memref<1x4xf32, #tpu.memory_space<vmem>>, %arg21: memref<2x4xf32, #tpu.memory_space<vmem>>, %arg22: memref<32x128xf32, #tpu.memory_space<vmem>>, %arg23: memref<16x512xf32, #tpu.memory_space<vmem>>, %arg24: memref<2x128xf32, #tpu.memory_space<vmem>>) attributes {dimension_semantics = [], scalar_prefetch = 0 : i64, scratch_operands = 3 : i64, tpu.core_type = #tpu.core_type<tc>} {
    %cst = arith.constant 0.000000e+00 : f32
    %0 = vector.broadcast %cst : f32 to vector<32x128xf32>
    %c0 = arith.constant 0 : index
    %c0_0 = arith.constant 0 : index
    %1 = vector.load %arg22[%c0, %c0_0] : memref<32x128xf32, #tpu.memory_space<vmem>>, vector<32x128xf32>
    tpu.vector_store %arg22[%c0, %c0_0], %0 {strides = array<i32>} : memref<32x128xf32, #tpu.memory_space<vmem>>, vector<32x128xf32>,
    %cst_1 = arith.constant 0.000000e+00 : f32
    %2 = vector.broadcast %cst_1 : f32 to vector<16x512xf32>
    %c0_2 = arith.constant 0 : index
    %c0_3 = arith.constant 0 : index
    %3 = vector.load %arg23[%c0_2, %c0_3] : memref<16x512xf32, #tpu.memory_space<vmem>>, vector<16x512xf32>
    tpu.vector_store %arg23[%c0_2, %c0_3], %2 {strides = array<i32>} : memref<16x512xf32, #tpu.memory_space<vmem>>, vector<16x512xf32>,
    %cst_4 = arith.constant 0.000000e+00 : f32
    %4 = vector.broadcast %cst_4 : f32 to vector<2x128xf32>
    %c0_5 = arith.constant 0 : index
    %c0_6 = arith.constant 0 : index
    %5 = vector.load %arg24[%c0_5, %c0_6] : memref<2x128xf32, #tpu.memory_space<vmem>>, vector<2x128xf32>
    tpu.vector_store %arg24[%c0_5, %c0_6], %4 {strides = array<i32>} : memref<2x128xf32, #tpu.memory_space<vmem>>, vector<2x128xf32>,
    %c0_7 = arith.constant 0 : index
    %c0_8 = arith.constant 0 : index
    %6 = vector.load %arg0[%c0_7, %c0_8] : memref<16x20xf32, #tpu.memory_space<vmem>>, vector<16x20xf32>
    %c0_9 = arith.constant 0 : index
    %c0_10 = arith.constant 0 : index
    %7 = vector.load %arg1[%c0_9, %c0_10] : memref<20x32xf32, #tpu.memory_space<vmem>>, vector<20x32xf32>
    %cst_11 = arith.constant dense<0.000000e+00> : vector<16x32xf32>
    %8 = tpu.matmul %6, %7, %cst_11 {dimension_numbers = #tpu.dot_dimension_numbers<[1], [0], [0], [1], [0, 0, 1, 1], [], []>} : vector<16x20xf32>, vector<20x32xf32>, vector<16x32xf32> -> vector<16x32xf32>
    %c0_12 = arith.constant 0 : index
    %c0_13 = arith.constant 0 : index
    %9 = vector.load %arg2[%c0_12, %c0_13] : memref<32x8xf32, #tpu.memory_space<vmem>>, vector<32x8xf32>
    %c0_14 = arith.constant 0 : index
    %c0_15 = arith.constant 0 : index
    %10 = vector.load %arg3[%c0_14, %c0_15] : memref<8x16xf32, #tpu.memory_space<vmem>>, vector<8x16xf32>
    %cst_16 = arith.constant dense<0.000000e+00> : vector<32x16xf32>
    %11 = tpu.matmul %9, %10, %cst_16 {dimension_numbers = #tpu.dot_dimension_numbers<[1], [0], [0], [1], [0, 0, 1, 1], [], []>} : vector<32x8xf32>, vector<8x16xf32>, vector<32x16xf32> -> vector<32x16xf32>
    %c0_17 = arith.constant 0 : index
    %c0_18 = arith.constant 0 : index
    %12 = vector.load %arg4[%c0_17, %c0_18] : memref<64x16xf32, #tpu.memory_space<vmem>>, vector<64x16xf32>
    %c0_19 = arith.constant 0 : index
    %c0_20 = arith.constant 0 : index
    %13 = vector.load %arg5[%c0_19, %c0_20] : memref<16x32xf32, #tpu.memory_space<vmem>>, vector<16x32xf32>
    %c0_21 = arith.constant 0 : index
    %c0_22 = arith.constant 0 : index
    %14 = vector.load %arg6[%c0_21, %c0_22] : memref<32x32xf32, #tpu.memory_space<vmem>>, vector<32x32xf32>
    %c0_23 = arith.constant 0 : index
    %c0_24 = arith.constant 0 : index
    %15 = vector.load %arg7[%c0_23, %c0_24] : memref<16x1xf32, #tpu.memory_space<vmem>>, vector<16x1xf32>
    %c0_25 = arith.constant 0 : index
    %c0_26 = arith.constant 0 : index
    %16 = vector.load %arg8[%c0_25, %c0_26] : memref<16x1xf32, #tpu.memory_space<vmem>>, vector<16x1xf32>
    %cst_27 = arith.constant 1.000000e+00 : f32
    %17 = vector.broadcast %cst_27 : f32 to vector<16x1xf32>
    %18 = arith.maximumf %15, %17 : vector<16x1xf32>
    %19 = tpu.reciprocal %18 {approx = true} : vector<16x1xf32> -> vector<16x1xf32>
    %cst_28 = arith.constant 1.000000e+00 : f32
    %20 = vector.broadcast %cst_28 : f32 to vector<16x1xf32>
    %21 = arith.addf %15, %20 : vector<16x1xf32>
    %22 = math.log %21 : vector<16x1xf32>
    %cst_29 = arith.constant 0.910239219 : f32
    %23 = vector.broadcast %cst_29 : f32 to vector<16x1xf32>
    %24 = arith.mulf %22, %23 : vector<16x1xf32>
    %cst_30 = arith.constant 9.99999974E-6 : f32
    %25 = vector.broadcast %cst_30 : f32 to vector<16x1xf32>
    %26 = arith.maximumf %22, %25 : vector<16x1xf32>
    %27 = tpu.reciprocal %26 {approx = true} : vector<16x1xf32> -> vector<16x1xf32>
    %cst_31 = arith.constant 1.09861231 : f32
    %28 = vector.broadcast %cst_31 : f32 to vector<16x1xf32>
    %29 = arith.mulf %28, %27 : vector<16x1xf32>
    %cst_32 = arith.constant 0.000000e+00 : f32
    %30 = vector.broadcast %cst_32 : f32 to vector<16x1xf32>
    %31 = arith.cmpf ogt, %15, %30 : vector<16x1xf32>
    %c0_33 = arith.constant 0 : index
    %c64 = arith.constant 64 : index
    %32 = vector.load %arg22[%c0_33, %c64] : memref<32x128xf32, #tpu.memory_space<vmem>>, vector<32x16xf32>
    tpu.vector_store %arg22[%c0_33, %c64], %11 {strides = array<i32>} : memref<32x128xf32, #tpu.memory_space<vmem>>, vector<32x16xf32>,
    %cst_34 = arith.constant dense<0.000000e+00> : vector<64x32xf32>
    %33 = tpu.matmul %12, %8, %cst_34 {dimension_numbers = #tpu.dot_dimension_numbers<[1], [0], [0], [1], [0, 0, 1, 1], [], []>} : vector<64x16xf32>, vector<16x32xf32>, vector<64x32xf32> -> vector<64x32xf32>
    %34 = vector.extract_strided_slice %33 {offsets = [0, 0], sizes = [32, 32], strides = [1, 1]} : vector<64x32xf32> to vector<32x32xf32>
    %c0_35 = arith.constant 0 : index
    %c0_36 = arith.constant 0 : index
    %35 = vector.load %arg22[%c0_35, %c0_36] : memref<32x128xf32, #tpu.memory_space<vmem>>, vector<32x32xf32>
    tpu.vector_store %arg22[%c0_35, %c0_36], %34 {strides = array<i32>} : memref<32x128xf32, #tpu.memory_space<vmem>>, vector<32x32xf32>,
    %36 = vector.extract_strided_slice %33 {offsets = [32, 0], sizes = [32, 32], strides = [1, 1]} : vector<64x32xf32> to vector<32x32xf32>
    %c0_37 = arith.constant 0 : index
    %c32 = arith.constant 32 : index
    %37 = vector.load %arg22[%c0_37, %c32] : memref<32x128xf32, #tpu.memory_space<vmem>>, vector<32x32xf32>
    tpu.vector_store %arg22[%c0_37, %c32], %36 {strides = array<i32>} : memref<32x128xf32, #tpu.memory_space<vmem>>, vector<32x32xf32>,
    %c0_38 = arith.constant 0 : index
    %c0_39 = arith.constant 0 : index
    %38 = vector.load %arg22[%c0_38, %c0_39] : memref<32x128xf32, #tpu.memory_space<vmem>>, vector<32x128xf32>
    %c0_40 = arith.constant 0 : index
    %c0_41 = arith.constant 0 : index
    %c0_42 = arith.constant 0 : index
    %39 = vector.load %arg9[%c0_40, %c0_41, %c0_42] : memref<2x128x32xf32, #tpu.memory_space<vmem>>, vector<1x128x32xf32>
    %40 = vector.shape_cast %39 : vector<1x128x32xf32> to vector<128x32xf32>
    %cst_43 = arith.constant dense<0.000000e+00> : vector<32x32xf32>
    %41 = tpu.matmul %38, %40, %cst_43 {dimension_numbers = #tpu.dot_dimension_numbers<[1], [0], [0], [1], [0, 0, 1, 1], [], []>} : vector<32x128xf32>, vector<128x32xf32>, vector<32x32xf32> -> vector<32x32xf32>
    %c0_44 = arith.constant 0 : index
    %c0_45 = arith.constant 0 : index
    %c0_46 = arith.constant 0 : index
    %42 = vector.load %arg10[%c0_44, %c0_45, %c0_46] : memref<2x1x32xf32, #tpu.memory_space<vmem>>, vector<1x1x32xf32>
    %43 = vector.shape_cast %42 : vector<1x1x32xf32> to vector<1x32xf32>
    %44 = vector.broadcast %43 : vector<1x32xf32> to vector<32x32xf32>
    %45 = arith.addf %41, %44 : vector<32x32xf32>
    %cst_47 = arith.constant dense<0.000000e+00> : vector<16x32xf32>
    %46 = tpu.matmul %13, %45, %cst_47 {dimension_numbers = #tpu.dot_dimension_numbers<[1], [0], [0], [1], [0, 0, 1, 1], [], []>} : vector<16x32xf32>, vector<32x32xf32>, vector<16x32xf32> -> vector<16x32xf32>
    %47 = arith.mulf %45, %45 : vector<32x32xf32>
    %cst_48 = arith.constant dense<0.000000e+00> : vector<16x32xf32>
    %48 = tpu.matmul %13, %47, %cst_48 {dimension_numbers = #tpu.dot_dimension_numbers<[1], [0], [0], [1], [0, 0, 1, 1], [], []>} : vector<16x32xf32>, vector<32x32xf32>, vector<16x32xf32> -> vector<16x32xf32>
    %cst_49 = arith.constant dense<0.000000e+00> : vector<32x32xf32>
    %49 = tpu.matmul %14, %45, %cst_49 {dimension_numbers = #tpu.dot_dimension_numbers<[1], [0], [0], [1], [0, 0, 1, 1], [], []>} : vector<32x32xf32>, vector<32x32xf32>, vector<32x32xf32> -> vector<32x32xf32>
    %cst_50 = arith.constant 0.000000e+00 : f32
    %cst_51 = arith.constant 1.000000e+30 : f32
    %50 = arith.subf %cst_50, %cst_51 : f32
    %51 = vector.broadcast %50 : f32 to vector<16x32xf32>
    %cst_52 = arith.constant 1.000000e+30 : f32
    %52 = vector.broadcast %cst_52 : f32 to vector<16x32xf32>
    %53 = vector.extract_strided_slice %49 {offsets = [0, 0], sizes = [16, 32], strides = [1, 1]} : vector<32x32xf32> to vector<16x32xf32>
    %cst_53 = arith.constant 0.000000e+00 : f32
    %54 = vector.broadcast %cst_53 : f32 to vector<16x1xf32>
    %55 = arith.cmpf ogt, %15, %54 : vector<16x1xf32>
    %cst_54 = arith.constant 0.000000e+00 : f32
    %cst_55 = arith.constant 1.000000e+30 : f32
    %56 = arith.subf %cst_54, %cst_55 : f32
    %57 = vector.shape_cast %55 : vector<16x1xi1> to vector<16x1xi1>
    %58 = vector.broadcast %57 : vector<16x1xi1> to vector<16x32xi1>
    %59 = vector.broadcast %56 : f32 to vector<16x32xf32>
    %60 = arith.select %58, %53, %59 : vector<16x32xi1>, vector<16x32xf32>
    %61 = arith.maximumf %51, %60 : vector<16x32xf32>
    %cst_56 = arith.constant 1.000000e+30 : f32
    %62 = vector.shape_cast %55 : vector<16x1xi1> to vector<16x1xi1>
    %63 = vector.broadcast %62 : vector<16x1xi1> to vector<16x32xi1>
    %64 = vector.broadcast %cst_56 : f32 to vector<16x32xf32>
    %65 = arith.select %63, %53, %64 : vector<16x32xi1>, vector<16x32xf32>
    %66 = arith.minimumf %52, %65 : vector<16x32xf32>
    %67 = vector.extract_strided_slice %49 {offsets = [16, 0], sizes = [16, 32], strides = [1, 1]} : vector<32x32xf32> to vector<16x32xf32>
    %cst_57 = arith.constant 1.000000e+00 : f32
    %68 = vector.broadcast %cst_57 : f32 to vector<16x1xf32>
    %69 = arith.cmpf ogt, %15, %68 : vector<16x1xf32>
    %cst_58 = arith.constant 0.000000e+00 : f32
    %cst_59 = arith.constant 1.000000e+30 : f32
    %70 = arith.subf %cst_58, %cst_59 : f32
    %71 = vector.shape_cast %69 : vector<16x1xi1> to vector<16x1xi1>
    %72 = vector.broadcast %71 : vector<16x1xi1> to vector<16x32xi1>
    %73 = vector.broadcast %70 : f32 to vector<16x32xf32>
    %74 = arith.select %72, %67, %73 : vector<16x32xi1>, vector<16x32xf32>
    %75 = arith.maximumf %61, %74 : vector<16x32xf32>
    %cst_60 = arith.constant 1.000000e+30 : f32
    %76 = vector.shape_cast %69 : vector<16x1xi1> to vector<16x1xi1>
    %77 = vector.broadcast %76 : vector<16x1xi1> to vector<16x32xi1>
    %78 = vector.broadcast %cst_60 : f32 to vector<16x32xf32>
    %79 = arith.select %77, %67, %78 : vector<16x32xi1>, vector<16x32xf32>
    %80 = arith.minimumf %66, %79 : vector<16x32xf32>
    %cst_61 = arith.constant 0.000000e+00 : f32
    %81 = vector.shape_cast %31 : vector<16x1xi1> to vector<16x1xi1>
    %82 = vector.broadcast %81 : vector<16x1xi1> to vector<16x32xi1>
    %83 = vector.broadcast %cst_61 : f32 to vector<16x32xf32>
    %84 = arith.select %82, %75, %83 : vector<16x32xi1>, vector<16x32xf32>
    %cst_62 = arith.constant 0.000000e+00 : f32
    %85 = vector.shape_cast %31 : vector<16x1xi1> to vector<16x1xi1>
    %86 = vector.broadcast %85 : vector<16x1xi1> to vector<16x32xi1>
    %87 = vector.broadcast %cst_62 : f32 to vector<16x32xf32>
    %88 = arith.select %86, %80, %87 : vector<16x32xi1>, vector<16x32xf32>
    %89 = vector.broadcast %19 : vector<16x1xf32> to vector<16x32xf32>
    %90 = arith.mulf %46, %89 : vector<16x32xf32>
    %91 = vector.broadcast %19 : vector<16x1xf32> to vector<16x32xf32>
    %92 = arith.mulf %48, %91 : vector<16x32xf32>
    %93 = arith.mulf %90, %90 : vector<16x32xf32>
    %94 = arith.subf %92, %93 : vector<16x32xf32>
    %cst_63 = arith.constant 0.000000e+00 : f32
    %95 = vector.broadcast %cst_63 : f32 to vector<16x32xf32>
    %96 = arith.maximumf %94, %95 : vector<16x32xf32>
    %cst_64 = arith.constant 9.99999974E-6 : f32
    %97 = vector.broadcast %cst_64 : f32 to vector<16x32xf32>
    %98 = arith.addf %96, %97 : vector<16x32xf32>
    %99 = math.sqrt %98 : vector<16x32xf32>
    %c0_65 = arith.constant 0 : index
    %c0_66 = arith.constant 0 : index
    %100 = vector.load %arg23[%c0_65, %c0_66] : memref<16x512xf32, #tpu.memory_space<vmem>>, vector<16x32xf32>
    tpu.vector_store %arg23[%c0_65, %c0_66], %8 {strides = array<i32>} : memref<16x512xf32, #tpu.memory_space<vmem>>, vector<16x32xf32>,
    %c0_67 = arith.constant 0 : index
    %c32_68 = arith.constant 32 : index
    %101 = vector.load %arg23[%c0_67, %c32_68] : memref<16x512xf32, #tpu.memory_space<vmem>>, vector<16x32xf32>
    tpu.vector_store %arg23[%c0_67, %c32_68], %90 {strides = array<i32>} : memref<16x512xf32, #tpu.memory_space<vmem>>, vector<16x32xf32>,
    %102 = vector.broadcast %24 : vector<16x1xf32> to vector<16x32xf32>
    %103 = arith.mulf %90, %102 : vector<16x32xf32>
    %c0_69 = arith.constant 0 : index
    %c160 = arith.constant 160 : index
    %104 = vector.load %arg23[%c0_69, %c160] : memref<16x512xf32, #tpu.memory_space<vmem>>, vector<16x32xf32>
    tpu.vector_store %arg23[%c0_69, %c160], %103 {strides = array<i32>} : memref<16x512xf32, #tpu.memory_space<vmem>>, vector<16x32xf32>,
    %105 = vector.broadcast %29 : vector<16x1xf32> to vector<16x32xf32>
    %106 = arith.mulf %90, %105 : vector<16x32xf32>
    %c0_70 = arith.constant 0 : index
    %c288 = arith.constant 288 : index
    %107 = vector.load %arg23[%c0_70, %c288] : memref<16x512xf32, #tpu.memory_space<vmem>>, vector<16x32xf32>
    tpu.vector_store %arg23[%c0_70, %c288], %106 {strides = array<i32>} : memref<16x512xf32, #tpu.memory_space<vmem>>, vector<16x32xf32>,
    %c0_71 = arith.constant 0 : index
    %c64_72 = arith.constant 64 : index
    %108 = vector.load %arg23[%c0_71, %c64_72] : memref<16x512xf32, #tpu.memory_space<vmem>>, vector<16x32xf32>
    tpu.vector_store %arg23[%c0_71, %c64_72], %84 {strides = array<i32>} : memref<16x512xf32, #tpu.memory_space<vmem>>, vector<16x32xf32>,
    %109 = vector.broadcast %24 : vector<16x1xf32> to vector<16x32xf32>
    %110 = arith.mulf %84, %109 : vector<16x32xf32>
    %c0_73 = arith.constant 0 : index
    %c192 = arith.constant 192 : index
    %111 = vector.load %arg23[%c0_73, %c192] : memref<16x512xf32, #tpu.memory_space<vmem>>, vector<16x32xf32>
    tpu.vector_store %arg23[%c0_73, %c192], %110 {strides = array<i32>} : memref<16x512xf32, #tpu.memory_space<vmem>>, vector<16x32xf32>,
    %112 = vector.broadcast %29 : vector<16x1xf32> to vector<16x32xf32>
    %113 = arith.mulf %84, %112 : vector<16x32xf32>
    %c0_74 = arith.constant 0 : index
    %c320 = arith.constant 320 : index
    %114 = vector.load %arg23[%c0_74, %c320] : memref<16x512xf32, #tpu.memory_space<vmem>>, vector<16x32xf32>
    tpu.vector_store %arg23[%c0_74, %c320], %113 {strides = array<i32>} : memref<16x512xf32, #tpu.memory_space<vmem>>, vector<16x32xf32>,
    %c0_75 = arith.constant 0 : index
    %c96 = arith.constant 96 : index
    %115 = vector.load %arg23[%c0_75, %c96] : memref<16x512xf32, #tpu.memory_space<vmem>>, vector<16x32xf32>
    tpu.vector_store %arg23[%c0_75, %c96], %88 {strides = array<i32>} : memref<16x512xf32, #tpu.memory_space<vmem>>, vector<16x32xf32>,
    %116 = vector.broadcast %24 : vector<16x1xf32> to vector<16x32xf32>
    %117 = arith.mulf %88, %116 : vector<16x32xf32>
    %c0_76 = arith.constant 0 : index
    %c224 = arith.constant 224 : index
    %118 = vector.load %arg23[%c0_76, %c224] : memref<16x512xf32, #tpu.memory_space<vmem>>, vector<16x32xf32>
    tpu.vector_store %arg23[%c0_76, %c224], %117 {strides = array<i32>} : memref<16x512xf32, #tpu.memory_space<vmem>>, vector<16x32xf32>,
    %119 = vector.broadcast %29 : vector<16x1xf32> to vector<16x32xf32>
    %120 = arith.mulf %88, %119 : vector<16x32xf32>
    %c0_77 = arith.constant 0 : index
    %c352 = arith.constant 352 : index
    %121 = vector.load %arg23[%c0_77, %c352] : memref<16x512xf32, #tpu.memory_space<vmem>>, vector<16x32xf32>
    tpu.vector_store %arg23[%c0_77, %c352], %120 {strides = array<i32>} : memref<16x512xf32, #tpu.memory_space<vmem>>, vector<16x32xf32>,
    %c0_78 = arith.constant 0 : index
    %c128 = arith.constant 128 : index
    %122 = vector.load %arg23[%c0_78, %c128] : memref<16x512xf32, #tpu.memory_space<vmem>>, vector<16x32xf32>
    tpu.vector_store %arg23[%c0_78, %c128], %99 {strides = array<i32>} : memref<16x512xf32, #tpu.memory_space<vmem>>, vector<16x32xf32>,
    %123 = vector.broadcast %24 : vector<16x1xf32> to vector<16x32xf32>
    %124 = arith.mulf %99, %123 : vector<16x32xf32>
    %c0_79 = arith.constant 0 : index
    %c256 = arith.constant 256 : index
    %125 = vector.load %arg23[%c0_79, %c256] : memref<16x512xf32, #tpu.memory_space<vmem>>, vector<16x32xf32>
    tpu.vector_store %arg23[%c0_79, %c256], %124 {strides = array<i32>} : memref<16x512xf32, #tpu.memory_space<vmem>>, vector<16x32xf32>,
    %126 = vector.broadcast %29 : vector<16x1xf32> to vector<16x32xf32>
    %127 = arith.mulf %99, %126 : vector<16x32xf32>
    %c0_80 = arith.constant 0 : index
    %c384 = arith.constant 384 : index
    %128 = vector.load %arg23[%c0_80, %c384] : memref<16x512xf32, #tpu.memory_space<vmem>>, vector<16x32xf32>
    tpu.vector_store %arg23[%c0_80, %c384], %127 {strides = array<i32>} : memref<16x512xf32, #tpu.memory_space<vmem>>, vector<16x32xf32>,
    %c0_81 = arith.constant 0 : index
    %c0_82 = arith.constant 0 : index
    %129 = vector.load %arg23[%c0_81, %c0_82] : memref<16x512xf32, #tpu.memory_space<vmem>>, vector<16x512xf32>
    %c0_83 = arith.constant 0 : index
    %c0_84 = arith.constant 0 : index
    %c0_85 = arith.constant 0 : index
    %130 = vector.load %arg11[%c0_83, %c0_84, %c0_85] : memref<2x512x32xf32, #tpu.memory_space<vmem>>, vector<1x512x32xf32>
    %131 = vector.shape_cast %130 : vector<1x512x32xf32> to vector<512x32xf32>
    %cst_86 = arith.constant dense<0.000000e+00> : vector<16x32xf32>
    %132 = tpu.matmul %129, %131, %cst_86 {dimension_numbers = #tpu.dot_dimension_numbers<[1], [0], [0], [1], [0, 0, 1, 1], [], []>} : vector<16x512xf32>, vector<512x32xf32>, vector<16x32xf32> -> vector<16x32xf32>
    %c0_87 = arith.constant 0 : index
    %c0_88 = arith.constant 0 : index
    %c0_89 = arith.constant 0 : index
    %133 = vector.load %arg12[%c0_87, %c0_88, %c0_89] : memref<2x1x32xf32, #tpu.memory_space<vmem>>, vector<1x1x32xf32>
    %134 = vector.shape_cast %133 : vector<1x1x32xf32> to vector<1x32xf32>
    %135 = vector.broadcast %134 : vector<1x32xf32> to vector<16x32xf32>
    %136 = arith.addf %132, %135 : vector<16x32xf32>
    %137 = vector.broadcast %16 : vector<16x1xf32> to vector<16x32xf32>
    %138 = arith.mulf %136, %137 : vector<16x32xf32>
    %c0_90 = arith.constant 0 : index
    %c0_91 = arith.constant 0 : index
    %c0_92 = arith.constant 0 : index
    %139 = vector.load %arg13[%c0_90, %c0_91, %c0_92] : memref<2x32x32xf32, #tpu.memory_space<vmem>>, vector<1x32x32xf32>
    %140 = vector.shape_cast %139 : vector<1x32x32xf32> to vector<32x32xf32>
    %cst_93 = arith.constant dense<0.000000e+00> : vector<16x32xf32>
    %141 = tpu.matmul %138, %140, %cst_93 {dimension_numbers = #tpu.dot_dimension_numbers<[1], [0], [0], [1], [0, 0, 1, 1], [], []>} : vector<16x32xf32>, vector<32x32xf32>, vector<16x32xf32> -> vector<16x32xf32>
    %c0_94 = arith.constant 0 : index
    %c0_95 = arith.constant 0 : index
    %c0_96 = arith.constant 0 : index
    %142 = vector.load %arg14[%c0_94, %c0_95, %c0_96] : memref<2x1x32xf32, #tpu.memory_space<vmem>>, vector<1x1x32xf32>
    %143 = vector.shape_cast %142 : vector<1x1x32xf32> to vector<1x32xf32>
    %144 = vector.broadcast %143 : vector<1x32xf32> to vector<16x32xf32>
    %145 = arith.addf %141, %144 : vector<16x32xf32>
    %cst_97 = arith.constant 0.000000e+00 : f32
    %146 = vector.broadcast %cst_97 : f32 to vector<16x32xf32>
    %147 = arith.cmpf oge, %145, %146 : vector<16x32xf32>
    %cst_98 = arith.constant 0.00999999977 : f32
    %148 = vector.broadcast %cst_98 : f32 to vector<16x32xf32>
    %149 = arith.mulf %148, %145 : vector<16x32xf32>
    %150 = arith.select %147, %145, %149 : vector<16x32xi1>, vector<16x32xf32>
    %151 = arith.addf %8, %150 : vector<16x32xf32>
    %cst_99 = arith.constant dense<0.000000e+00> : vector<64x32xf32>
    %152 = tpu.matmul %12, %151, %cst_99 {dimension_numbers = #tpu.dot_dimension_numbers<[1], [0], [0], [1], [0, 0, 1, 1], [], []>} : vector<64x16xf32>, vector<16x32xf32>, vector<64x32xf32> -> vector<64x32xf32>
    %153 = vector.extract_strided_slice %152 {offsets = [0, 0], sizes = [32, 32], strides = [1, 1]} : vector<64x32xf32> to vector<32x32xf32>
    %c0_100 = arith.constant 0 : index
    %c0_101 = arith.constant 0 : index
    %154 = vector.load %arg22[%c0_100, %c0_101] : memref<32x128xf32, #tpu.memory_space<vmem>>, vector<32x32xf32>
    tpu.vector_store %arg22[%c0_100, %c0_101], %153 {strides = array<i32>} : memref<32x128xf32, #tpu.memory_space<vmem>>, vector<32x32xf32>,
    %155 = vector.extract_strided_slice %152 {offsets = [32, 0], sizes = [32, 32], strides = [1, 1]} : vector<64x32xf32> to vector<32x32xf32>
    %c0_102 = arith.constant 0 : index
    %c32_103 = arith.constant 32 : index
    %156 = vector.load %arg22[%c0_102, %c32_103] : memref<32x128xf32, #tpu.memory_space<vmem>>, vector<32x32xf32>
    tpu.vector_store %arg22[%c0_102, %c32_103], %155 {strides = array<i32>} : memref<32x128xf32, #tpu.memory_space<vmem>>, vector<32x32xf32>,
    %c0_104 = arith.constant 0 : index
    %c0_105 = arith.constant 0 : index
    %157 = vector.load %arg22[%c0_104, %c0_105] : memref<32x128xf32, #tpu.memory_space<vmem>>, vector<32x128xf32>
    %c1 = arith.constant 1 : index
    %c0_106 = arith.constant 0 : index
    %c0_107 = arith.constant 0 : index
    %158 = vector.load %arg9[%c1, %c0_106, %c0_107] : memref<2x128x32xf32, #tpu.memory_space<vmem>>, vector<1x128x32xf32>
    %159 = vector.shape_cast %158 : vector<1x128x32xf32> to vector<128x32xf32>
    %cst_108 = arith.constant dense<0.000000e+00> : vector<32x32xf32>
    %160 = tpu.matmul %157, %159, %cst_108 {dimension_numbers = #tpu.dot_dimension_numbers<[1], [0], [0], [1], [0, 0, 1, 1], [], []>} : vector<32x128xf32>, vector<128x32xf32>, vector<32x32xf32> -> vector<32x32xf32>
    %c1_109 = arith.constant 1 : index
    %c0_110 = arith.constant 0 : index
    %c0_111 = arith.constant 0 : index
    %161 = vector.load %arg10[%c1_109, %c0_110, %c0_111] : memref<2x1x32xf32, #tpu.memory_space<vmem>>, vector<1x1x32xf32>
    %162 = vector.shape_cast %161 : vector<1x1x32xf32> to vector<1x32xf32>
    %163 = vector.broadcast %162 : vector<1x32xf32> to vector<32x32xf32>
    %164 = arith.addf %160, %163 : vector<32x32xf32>
    %cst_112 = arith.constant dense<0.000000e+00> : vector<16x32xf32>
    %165 = tpu.matmul %13, %164, %cst_112 {dimension_numbers = #tpu.dot_dimension_numbers<[1], [0], [0], [1], [0, 0, 1, 1], [], []>} : vector<16x32xf32>, vector<32x32xf32>, vector<16x32xf32> -> vector<16x32xf32>
    %166 = arith.mulf %164, %164 : vector<32x32xf32>
    %cst_113 = arith.constant dense<0.000000e+00> : vector<16x32xf32>
    %167 = tpu.matmul %13, %166, %cst_113 {dimension_numbers = #tpu.dot_dimension_numbers<[1], [0], [0], [1], [0, 0, 1, 1], [], []>} : vector<16x32xf32>, vector<32x32xf32>, vector<16x32xf32> -> vector<16x32xf32>
    %cst_114 = arith.constant dense<0.000000e+00> : vector<32x32xf32>
    %168 = tpu.matmul %14, %164, %cst_114 {dimension_numbers = #tpu.dot_dimension_numbers<[1], [0], [0], [1], [0, 0, 1, 1], [], []>} : vector<32x32xf32>, vector<32x32xf32>, vector<32x32xf32> -> vector<32x32xf32>
    %cst_115 = arith.constant 0.000000e+00 : f32
    %cst_116 = arith.constant 1.000000e+30 : f32
    %169 = arith.subf %cst_115, %cst_116 : f32
    %170 = vector.broadcast %169 : f32 to vector<16x32xf32>
    %cst_117 = arith.constant 1.000000e+30 : f32
    %171 = vector.broadcast %cst_117 : f32 to vector<16x32xf32>
    %172 = vector.extract_strided_slice %168 {offsets = [0, 0], sizes = [16, 32], strides = [1, 1]} : vector<32x32xf32> to vector<16x32xf32>
    %cst_118 = arith.constant 0.000000e+00 : f32
    %173 = vector.broadcast %cst_118 : f32 to vector<16x1xf32>
    %174 = arith.cmpf ogt, %15, %173 : vector<16x1xf32>
    %cst_119 = arith.constant 0.000000e+00 : f32
    %cst_120 = arith.constant 1.000000e+30 : f32
    %175 = arith.subf %cst_119, %cst_120 : f32
    %176 = vector.shape_cast %174 : vector<16x1xi1> to vector<16x1xi1>
    %177 = vector.broadcast %176 : vector<16x1xi1> to vector<16x32xi1>
    %178 = vector.broadcast %175 : f32 to vector<16x32xf32>
    %179 = arith.select %177, %172, %178 : vector<16x32xi1>, vector<16x32xf32>
    %180 = arith.maximumf %170, %179 : vector<16x32xf32>
    %cst_121 = arith.constant 1.000000e+30 : f32
    %181 = vector.shape_cast %174 : vector<16x1xi1> to vector<16x1xi1>
    %182 = vector.broadcast %181 : vector<16x1xi1> to vector<16x32xi1>
    %183 = vector.broadcast %cst_121 : f32 to vector<16x32xf32>
    %184 = arith.select %182, %172, %183 : vector<16x32xi1>, vector<16x32xf32>
    %185 = arith.minimumf %171, %184 : vector<16x32xf32>
    %186 = vector.extract_strided_slice %168 {offsets = [16, 0], sizes = [16, 32], strides = [1, 1]} : vector<32x32xf32> to vector<16x32xf32>
    %cst_122 = arith.constant 1.000000e+00 : f32
    %187 = vector.broadcast %cst_122 : f32 to vector<16x1xf32>
    %188 = arith.cmpf ogt, %15, %187 : vector<16x1xf32>
    %cst_123 = arith.constant 0.000000e+00 : f32
    %cst_124 = arith.constant 1.000000e+30 : f32
    %189 = arith.subf %cst_123, %cst_124 : f32
    %190 = vector.shape_cast %188 : vector<16x1xi1> to vector<16x1xi1>
    %191 = vector.broadcast %190 : vector<16x1xi1> to vector<16x32xi1>
    %192 = vector.broadcast %189 : f32 to vector<16x32xf32>
    %193 = arith.select %191, %186, %192 : vector<16x32xi1>, vector<16x32xf32>
    %194 = arith.maximumf %180, %193 : vector<16x32xf32>
    %cst_125 = arith.constant 1.000000e+30 : f32
    %195 = vector.shape_cast %188 : vector<16x1xi1> to vector<16x1xi1>
    %196 = vector.broadcast %195 : vector<16x1xi1> to vector<16x32xi1>
    %197 = vector.broadcast %cst_125 : f32 to vector<16x32xf32>
    %198 = arith.select %196, %186, %197 : vector<16x32xi1>, vector<16x32xf32>
    %199 = arith.minimumf %185, %198 : vector<16x32xf32>
    %cst_126 = arith.constant 0.000000e+00 : f32
    %200 = vector.shape_cast %31 : vector<16x1xi1> to vector<16x1xi1>
    %201 = vector.broadcast %200 : vector<16x1xi1> to vector<16x32xi1>
    %202 = vector.broadcast %cst_126 : f32 to vector<16x32xf32>
    %203 = arith.select %201, %194, %202 : vector<16x32xi1>, vector<16x32xf32>
    %cst_127 = arith.constant 0.000000e+00 : f32
    %204 = vector.shape_cast %31 : vector<16x1xi1> to vector<16x1xi1>
    %205 = vector.broadcast %204 : vector<16x1xi1> to vector<16x32xi1>
    %206 = vector.broadcast %cst_127 : f32 to vector<16x32xf32>
    %207 = arith.select %205, %199, %206 : vector<16x32xi1>, vector<16x32xf32>
    %208 = vector.broadcast %19 : vector<16x1xf32> to vector<16x32xf32>
    %209 = arith.mulf %165, %208 : vector<16x32xf32>
    %210 = vector.broadcast %19 : vector<16x1xf32> to vector<16x32xf32>
    %211 = arith.mulf %167, %210 : vector<16x32xf32>
    %212 = arith.mulf %209, %209 : vector<16x32xf32>
    %213 = arith.subf %211, %212 : vector<16x32xf32>
    %cst_128 = arith.constant 0.000000e+00 : f32
    %214 = vector.broadcast %cst_128 : f32 to vector<16x32xf32>
    %215 = arith.maximumf %213, %214 : vector<16x32xf32>
    %cst_129 = arith.constant 9.99999974E-6 : f32
    %216 = vector.broadcast %cst_129 : f32 to vector<16x32xf32>
    %217 = arith.addf %215, %216 : vector<16x32xf32>
    %218 = math.sqrt %217 : vector<16x32xf32>
    %c0_130 = arith.constant 0 : index
    %c0_131 = arith.constant 0 : index
    %219 = vector.load %arg23[%c0_130, %c0_131] : memref<16x512xf32, #tpu.memory_space<vmem>>, vector<16x32xf32>
    tpu.vector_store %arg23[%c0_130, %c0_131], %151 {strides = array<i32>} : memref<16x512xf32, #tpu.memory_space<vmem>>, vector<16x32xf32>,
    %c0_132 = arith.constant 0 : index
    %c32_133 = arith.constant 32 : index
    %220 = vector.load %arg23[%c0_132, %c32_133] : memref<16x512xf32, #tpu.memory_space<vmem>>, vector<16x32xf32>
    tpu.vector_store %arg23[%c0_132, %c32_133], %209 {strides = array<i32>} : memref<16x512xf32, #tpu.memory_space<vmem>>, vector<16x32xf32>,
    %221 = vector.broadcast %24 : vector<16x1xf32> to vector<16x32xf32>
    %222 = arith.mulf %209, %221 : vector<16x32xf32>
    %c0_134 = arith.constant 0 : index
    %c160_135 = arith.constant 160 : index
    %223 = vector.load %arg23[%c0_134, %c160_135] : memref<16x512xf32, #tpu.memory_space<vmem>>, vector<16x32xf32>
    tpu.vector_store %arg23[%c0_134, %c160_135], %222 {strides = array<i32>} : memref<16x512xf32, #tpu.memory_space<vmem>>, vector<16x32xf32>,
    %224 = vector.broadcast %29 : vector<16x1xf32> to vector<16x32xf32>
    %225 = arith.mulf %209, %224 : vector<16x32xf32>
    %c0_136 = arith.constant 0 : index
    %c288_137 = arith.constant 288 : index
    %226 = vector.load %arg23[%c0_136, %c288_137] : memref<16x512xf32, #tpu.memory_space<vmem>>, vector<16x32xf32>
    tpu.vector_store %arg23[%c0_136, %c288_137], %225 {strides = array<i32>} : memref<16x512xf32, #tpu.memory_space<vmem>>, vector<16x32xf32>,
    %c0_138 = arith.constant 0 : index
    %c64_139 = arith.constant 64 : index
    %227 = vector.load %arg23[%c0_138, %c64_139] : memref<16x512xf32, #tpu.memory_space<vmem>>, vector<16x32xf32>
    tpu.vector_store %arg23[%c0_138, %c64_139], %203 {strides = array<i32>} : memref<16x512xf32, #tpu.memory_space<vmem>>, vector<16x32xf32>,
    %228 = vector.broadcast %24 : vector<16x1xf32> to vector<16x32xf32>
    %229 = arith.mulf %203, %228 : vector<16x32xf32>
    %c0_140 = arith.constant 0 : index
    %c192_141 = arith.constant 192 : index
    %230 = vector.load %arg23[%c0_140, %c192_141] : memref<16x512xf32, #tpu.memory_space<vmem>>, vector<16x32xf32>
    tpu.vector_store %arg23[%c0_140, %c192_141], %229 {strides = array<i32>} : memref<16x512xf32, #tpu.memory_space<vmem>>, vector<16x32xf32>,
    %231 = vector.broadcast %29 : vector<16x1xf32> to vector<16x32xf32>
    %232 = arith.mulf %203, %231 : vector<16x32xf32>
    %c0_142 = arith.constant 0 : index
    %c320_143 = arith.constant 320 : index
    %233 = vector.load %arg23[%c0_142, %c320_143] : memref<16x512xf32, #tpu.memory_space<vmem>>, vector<16x32xf32>
    tpu.vector_store %arg23[%c0_142, %c320_143], %232 {strides = array<i32>} : memref<16x512xf32, #tpu.memory_space<vmem>>, vector<16x32xf32>,
    %c0_144 = arith.constant 0 : index
    %c96_145 = arith.constant 96 : index
    %234 = vector.load %arg23[%c0_144, %c96_145] : memref<16x512xf32, #tpu.memory_space<vmem>>, vector<16x32xf32>
    tpu.vector_store %arg23[%c0_144, %c96_145], %207 {strides = array<i32>} : memref<16x512xf32, #tpu.memory_space<vmem>>, vector<16x32xf32>,
    %235 = vector.broadcast %24 : vector<16x1xf32> to vector<16x32xf32>
    %236 = arith.mulf %207, %235 : vector<16x32xf32>
    %c0_146 = arith.constant 0 : index
    %c224_147 = arith.constant 224 : index
    %237 = vector.load %arg23[%c0_146, %c224_147] : memref<16x512xf32, #tpu.memory_space<vmem>>, vector<16x32xf32>
    tpu.vector_store %arg23[%c0_146, %c224_147], %236 {strides = array<i32>} : memref<16x512xf32, #tpu.memory_space<vmem>>, vector<16x32xf32>,
    %238 = vector.broadcast %29 : vector<16x1xf32> to vector<16x32xf32>
    %239 = arith.mulf %207, %238 : vector<16x32xf32>
    %c0_148 = arith.constant 0 : index
    %c352_149 = arith.constant 352 : index
    %240 = vector.load %arg23[%c0_148, %c352_149] : memref<16x512xf32, #tpu.memory_space<vmem>>, vector<16x32xf32>
    tpu.vector_store %arg23[%c0_148, %c352_149], %239 {strides = array<i32>} : memref<16x512xf32, #tpu.memory_space<vmem>>, vector<16x32xf32>,
    %c0_150 = arith.constant 0 : index
    %c128_151 = arith.constant 128 : index
    %241 = vector.load %arg23[%c0_150, %c128_151] : memref<16x512xf32, #tpu.memory_space<vmem>>, vector<16x32xf32>
    tpu.vector_store %arg23[%c0_150, %c128_151], %218 {strides = array<i32>} : memref<16x512xf32, #tpu.memory_space<vmem>>, vector<16x32xf32>,
    %242 = vector.broadcast %24 : vector<16x1xf32> to vector<16x32xf32>
    %243 = arith.mulf %218, %242 : vector<16x32xf32>
    %c0_152 = arith.constant 0 : index
    %c256_153 = arith.constant 256 : index
    %244 = vector.load %arg23[%c0_152, %c256_153] : memref<16x512xf32, #tpu.memory_space<vmem>>, vector<16x32xf32>
    tpu.vector_store %arg23[%c0_152, %c256_153], %243 {strides = array<i32>} : memref<16x512xf32, #tpu.memory_space<vmem>>, vector<16x32xf32>,
    %245 = vector.broadcast %29 : vector<16x1xf32> to vector<16x32xf32>
    %246 = arith.mulf %218, %245 : vector<16x32xf32>
    %c0_154 = arith.constant 0 : index
    %c384_155 = arith.constant 384 : index
    %247 = vector.load %arg23[%c0_154, %c384_155] : memref<16x512xf32, #tpu.memory_space<vmem>>, vector<16x32xf32>
    tpu.vector_store %arg23[%c0_154, %c384_155], %246 {strides = array<i32>} : memref<16x512xf32, #tpu.memory_space<vmem>>, vector<16x32xf32>,
    %c0_156 = arith.constant 0 : index
    %c0_157 = arith.constant 0 : index
    %248 = vector.load %arg23[%c0_156, %c0_157] : memref<16x512xf32, #tpu.memory_space<vmem>>, vector<16x512xf32>
    %c1_158 = arith.constant 1 : index
    %c0_159 = arith.constant 0 : index
    %c0_160 = arith.constant 0 : index
    %249 = vector.load %arg11[%c1_158, %c0_159, %c0_160] : memref<2x512x32xf32, #tpu.memory_space<vmem>>, vector<1x512x32xf32>
    %250 = vector.shape_cast %249 : vector<1x512x32xf32> to vector<512x32xf32>
    %cst_161 = arith.constant dense<0.000000e+00> : vector<16x32xf32>
    %251 = tpu.matmul %248, %250, %cst_161 {dimension_numbers = #tpu.dot_dimension_numbers<[1], [0], [0], [1], [0, 0, 1, 1], [], []>} : vector<16x512xf32>, vector<512x32xf32>, vector<16x32xf32> -> vector<16x32xf32>
    %c1_162 = arith.constant 1 : index
    %c0_163 = arith.constant 0 : index
    %c0_164 = arith.constant 0 : index
    %252 = vector.load %arg12[%c1_162, %c0_163, %c0_164] : memref<2x1x32xf32, #tpu.memory_space<vmem>>, vector<1x1x32xf32>
    %253 = vector.shape_cast %252 : vector<1x1x32xf32> to vector<1x32xf32>
    %254 = vector.broadcast %253 : vector<1x32xf32> to vector<16x32xf32>
    %255 = arith.addf %251, %254 : vector<16x32xf32>
    %256 = vector.broadcast %16 : vector<16x1xf32> to vector<16x32xf32>
    %257 = arith.mulf %255, %256 : vector<16x32xf32>
    %c1_165 = arith.constant 1 : index
    %c0_166 = arith.constant 0 : index
    %c0_167 = arith.constant 0 : index
    %258 = vector.load %arg13[%c1_165, %c0_166, %c0_167] : memref<2x32x32xf32, #tpu.memory_space<vmem>>, vector<1x32x32xf32>
    %259 = vector.shape_cast %258 : vector<1x32x32xf32> to vector<32x32xf32>
    %cst_168 = arith.constant dense<0.000000e+00> : vector<16x32xf32>
    %260 = tpu.matmul %257, %259, %cst_168 {dimension_numbers = #tpu.dot_dimension_numbers<[1], [0], [0], [1], [0, 0, 1, 1], [], []>} : vector<16x32xf32>, vector<32x32xf32>, vector<16x32xf32> -> vector<16x32xf32>
    %c1_169 = arith.constant 1 : index
    %c0_170 = arith.constant 0 : index
    %c0_171 = arith.constant 0 : index
    %261 = vector.load %arg14[%c1_169, %c0_170, %c0_171] : memref<2x1x32xf32, #tpu.memory_space<vmem>>, vector<1x1x32xf32>
    %262 = vector.shape_cast %261 : vector<1x1x32xf32> to vector<1x32xf32>
    %263 = vector.broadcast %262 : vector<1x32xf32> to vector<16x32xf32>
    %264 = arith.addf %260, %263 : vector<16x32xf32>
    %cst_172 = arith.constant 0.000000e+00 : f32
    %265 = vector.broadcast %cst_172 : f32 to vector<16x32xf32>
    %266 = arith.cmpf oge, %264, %265 : vector<16x32xf32>
    %cst_173 = arith.constant 0.00999999977 : f32
    %267 = vector.broadcast %cst_173 : f32 to vector<16x32xf32>
    %268 = arith.mulf %267, %264 : vector<16x32xf32>
    %269 = arith.select %266, %264, %268 : vector<16x32xi1>, vector<16x32xf32>
    %270 = arith.addf %151, %269 : vector<16x32xf32>
    %271 = vector.extract_strided_slice %270 {offsets = [0, 0], sizes = [8, 32], strides = [1, 1]} : vector<16x32xf32> to vector<8x32xf32>
    %cst_174 = arith.constant dense<0.000000e+00> : vector<32xf32>
    %272 = vector.multi_reduction <add>, %271, %cst_174 [0] : vector<8x32xf32> to vector<32xf32>
    %273 = vector.shape_cast %272 : vector<32xf32> to vector<1x32xf32>
    %cst_175 = arith.constant dense<0xFF800000> : vector<32xf32>
    %274 = vector.multi_reduction <maximumf>, %271, %cst_175 [0] : vector<8x32xf32> to vector<32xf32>
    %275 = vector.shape_cast %274 : vector<32xf32> to vector<1x32xf32>
    %c0_176 = arith.constant 0 : index
    %c0_177 = arith.constant 0 : index
    %276 = vector.load %arg24[%c0_176, %c0_177] : memref<2x128xf32, #tpu.memory_space<vmem>>, vector<1x32xf32>
    tpu.vector_store %arg24[%c0_176, %c0_177], %273 {strides = array<i32>} : memref<2x128xf32, #tpu.memory_space<vmem>>, vector<1x32xf32>,
    %cst_178 = arith.constant 1.250000e-01 : f32
    %277 = vector.broadcast %cst_178 : f32 to vector<1x32xf32>
    %278 = arith.mulf %273, %277 : vector<1x32xf32>
    %c0_179 = arith.constant 0 : index
    %c32_180 = arith.constant 32 : index
    %279 = vector.load %arg24[%c0_179, %c32_180] : memref<2x128xf32, #tpu.memory_space<vmem>>, vector<1x32xf32>
    tpu.vector_store %arg24[%c0_179, %c32_180], %278 {strides = array<i32>} : memref<2x128xf32, #tpu.memory_space<vmem>>, vector<1x32xf32>,
    %c0_181 = arith.constant 0 : index
    %c64_182 = arith.constant 64 : index
    %280 = vector.load %arg24[%c0_181, %c64_182] : memref<2x128xf32, #tpu.memory_space<vmem>>, vector<1x32xf32>
    tpu.vector_store %arg24[%c0_181, %c64_182], %275 {strides = array<i32>} : memref<2x128xf32, #tpu.memory_space<vmem>>, vector<1x32xf32>,
    %281 = vector.extract_strided_slice %270 {offsets = [8, 0], sizes = [8, 32], strides = [1, 1]} : vector<16x32xf32> to vector<8x32xf32>
    %cst_183 = arith.constant dense<0.000000e+00> : vector<32xf32>
    %282 = vector.multi_reduction <add>, %281, %cst_183 [0] : vector<8x32xf32> to vector<32xf32>
    %283 = vector.shape_cast %282 : vector<32xf32> to vector<1x32xf32>
    %cst_184 = arith.constant dense<0xFF800000> : vector<32xf32>
    %284 = vector.multi_reduction <maximumf>, %281, %cst_184 [0] : vector<8x32xf32> to vector<32xf32>
    %285 = vector.shape_cast %284 : vector<32xf32> to vector<1x32xf32>
    %c1_185 = arith.constant 1 : index
    %c0_186 = arith.constant 0 : index
    %286 = vector.load %arg24[%c1_185, %c0_186] : memref<2x128xf32, #tpu.memory_space<vmem>>, vector<1x32xf32>
    tpu.vector_store %arg24[%c1_185, %c0_186], %283 {strides = array<i32>} : memref<2x128xf32, #tpu.memory_space<vmem>>, vector<1x32xf32>,
    %cst_187 = arith.constant 1.250000e-01 : f32
    %287 = vector.broadcast %cst_187 : f32 to vector<1x32xf32>
    %288 = arith.mulf %283, %287 : vector<1x32xf32>
    %c1_188 = arith.constant 1 : index
    %c32_189 = arith.constant 32 : index
    %289 = vector.load %arg24[%c1_188, %c32_189] : memref<2x128xf32, #tpu.memory_space<vmem>>, vector<1x32xf32>
    tpu.vector_store %arg24[%c1_188, %c32_189], %288 {strides = array<i32>} : memref<2x128xf32, #tpu.memory_space<vmem>>, vector<1x32xf32>,
    %c1_190 = arith.constant 1 : index
    %c64_191 = arith.constant 64 : index
    %290 = vector.load %arg24[%c1_190, %c64_191] : memref<2x128xf32, #tpu.memory_space<vmem>>, vector<1x32xf32>
    tpu.vector_store %arg24[%c1_190, %c64_191], %285 {strides = array<i32>} : memref<2x128xf32, #tpu.memory_space<vmem>>, vector<1x32xf32>,
    %c0_192 = arith.constant 0 : index
    %c0_193 = arith.constant 0 : index
    %291 = vector.load %arg24[%c0_192, %c0_193] : memref<2x128xf32, #tpu.memory_space<vmem>>, vector<2x128xf32>
    %c0_194 = arith.constant 0 : index
    %c0_195 = arith.constant 0 : index
    %292 = vector.load %arg15[%c0_194, %c0_195] : memref<128x48xf32, #tpu.memory_space<vmem>>, vector<128x48xf32>
    %cst_196 = arith.constant dense<0.000000e+00> : vector<2x48xf32>
    %293 = tpu.matmul %291, %292, %cst_196 {dimension_numbers = #tpu.dot_dimension_numbers<[1], [0], [0], [1], [0, 0, 1, 1], [], []>} : vector<2x128xf32>, vector<128x48xf32>, vector<2x48xf32> -> vector<2x48xf32>
    %c0_197 = arith.constant 0 : index
    %c0_198 = arith.constant 0 : index
    %294 = vector.load %arg16[%c0_197, %c0_198] : memref<1x48xf32, #tpu.memory_space<vmem>>, vector<1x48xf32>
    %295 = vector.broadcast %294 : vector<1x48xf32> to vector<2x48xf32>
    %296 = arith.addf %293, %295 : vector<2x48xf32>
    %cst_199 = arith.constant 0.000000e+00 : f32
    %297 = vector.broadcast %cst_199 : f32 to vector<2x48xf32>
    %298 = arith.maximumf %296, %297 : vector<2x48xf32>
    %c0_200 = arith.constant 0 : index
    %c0_201 = arith.constant 0 : index
    %299 = vector.load %arg17[%c0_200, %c0_201] : memref<48x24xf32, #tpu.memory_space<vmem>>, vector<48x24xf32>
    %cst_202 = arith.constant dense<0.000000e+00> : vector<2x24xf32>
    %300 = tpu.matmul %298, %299, %cst_202 {dimension_numbers = #tpu.dot_dimension_numbers<[1], [0], [0], [1], [0, 0, 1, 1], [], []>} : vector<2x48xf32>, vector<48x24xf32>, vector<2x24xf32> -> vector<2x24xf32>
    %c0_203 = arith.constant 0 : index
    %c0_204 = arith.constant 0 : index
    %301 = vector.load %arg18[%c0_203, %c0_204] : memref<1x24xf32, #tpu.memory_space<vmem>>, vector<1x24xf32>
    %302 = vector.broadcast %301 : vector<1x24xf32> to vector<2x24xf32>
    %303 = arith.addf %300, %302 : vector<2x24xf32>
    %cst_205 = arith.constant 0.000000e+00 : f32
    %304 = vector.broadcast %cst_205 : f32 to vector<2x24xf32>
    %305 = arith.maximumf %303, %304 : vector<2x24xf32>
    %c0_206 = arith.constant 0 : index
    %c0_207 = arith.constant 0 : index
    %306 = vector.load %arg19[%c0_206, %c0_207] : memref<24x4xf32, #tpu.memory_space<vmem>>, vector<24x4xf32>
    %cst_208 = arith.constant dense<0.000000e+00> : vector<2x4xf32>
    %307 = tpu.matmul %305, %306, %cst_208 {dimension_numbers = #tpu.dot_dimension_numbers<[1], [0], [0], [1], [0, 0, 1, 1], [], []>} : vector<2x24xf32>, vector<24x4xf32>, vector<2x4xf32> -> vector<2x4xf32>
    %c0_209 = arith.constant 0 : index
    %c0_210 = arith.constant 0 : index
    %308 = vector.load %arg20[%c0_209, %c0_210] : memref<1x4xf32, #tpu.memory_space<vmem>>, vector<1x4xf32>
    %309 = vector.broadcast %308 : vector<1x4xf32> to vector<2x4xf32>
    %310 = arith.addf %307, %309 : vector<2x4xf32>
    %c0_211 = arith.constant 0 : index
    %c0_212 = arith.constant 0 : index
    %311 = vector.load %arg21[%c0_211, %c0_212] : memref<2x4xf32, #tpu.memory_space<vmem>>, vector<2x4xf32>
    tpu.vector_store %arg21[%c0_211, %c0_212], %310 {strides = array<i32>} : memref<2x4xf32, #tpu.memory_space<vmem>>, vector<2x4xf32>,
    return
  }
}

</mosaic_0001>

<bundles_post_ra>
// kernel: pna_forward.1
= control target key start
LH: loop header
LB: loop body
LE: loop exit
PB: predicated region body
PF: predicated region fallthrough
CT: control target
= control target key end

     0   :  { %s4814_s0 = inlined_call_operand.vmem [shape: f32[16,20], index: 0, kind: input, shape index: {}]   ;;  %s4815_s1 = inlined_call_operand.vmem [shape: f32[20,32], index: 1, kind: input, shape index: {}]   ;;  %s4816_s2 = inlined_call_operand.vmem [shape: f32[32,8], index: 2, kind: input, shape index: {}]   ;;  %s4817_s3 = inlined_call_operand.vmem [shape: f32[8,16], index: 3, kind: input, shape index: {}]   ;;  %s4818_s4 = inlined_call_operand.vmem [shape: f32[64,16], index: 4, kind: input, shape index: {}]   ;;  %s4819_s5 = inlined_call_operand.vmem [shape: f32[16,32], index: 5, kind: input, shape index: {}]   ;;  %s4820_s6 = inlined_call_operand.vmem [shape: f32[32,32], index: 6, kind: input, shape index: {}]   ;;  %s4821_s7 = inlined_call_operand.vmem [shape: f32[16,1], index: 7, kind: input, shape index: {}]   ;;  %s4822_s8 = inlined_call_operand.vmem [shape: f32[16,1], index: 8, kind: input, shape index: {}]   ;;  %s4823_s9 = inlined_call_operand.vmem [shape: f32[2,128,32], index: 9, kind: input, shape index: {}]   ;;  %s4824_s10 = inlined_call_operand.vmem [shape: f32[2,1,32], index: 10, kind: input, shape index: {}]   ;;  %s4825_s11 = inlined_call_operand.vmem [shape: f32[2,512,32], index: 11, kind: input, shape index: {}]   ;;  %s4826_s12 = inlined_call_operand.vmem [shape: f32[2,1,32], index: 12, kind: input, shape index: {}]   ;;  %s4827_s13 = inlined_call_operand.vmem [shape: f32[2,32,32], index: 13, kind: input, shape index: {}]   ;;  %s4828_s14 = inlined_call_operand.vmem [shape: f32[2,1,32], index: 14, kind: input, shape index: {}]   ;;  %s4829_s15 = inlined_call_operand.vmem [shape: f32[128,48], index: 15, kind: input, shape index: {}]   ;;  %s4830_s16 = inlined_call_operand.vmem [shape: f32[1,48], index: 16, kind: input, shape index: {}]   ;;  %s4831_s17 = inlined_call_operand.vmem [shape: f32[48,24], index: 17, kind: input, shape index: {}]   ;;  %s4832_s18 = inlined_call_operand.vmem [shape: f32[1,24], index: 18, kind: input, shape index: {}]   ;;  %s4833_s19 = inlined_call_operand.vmem [shape: f32[24,4], index: 19, kind: input, shape index: {}]   ;;  %s4834_s20 = inlined_call_operand.vmem [shape: f32[1,4], index: 20, kind: input, shape index: {}]   ;;  %s4835_s21 = inlined_call_operand.hbm [shape: f32[2,4], index: 21, kind: output, shape index: {}]  }
   0x1   :  { %4841 = sst [smem:[#allocation8_spill]] %s4814_s0 }
   0x2   :  { %4842 = sst [smem:[#allocation9_spill]] %s4815_s1 }
   0x3   :  { %4843 = sst [smem:[#allocation10_spill]] %s4816_s2 }
   0x4   :  { %4844 = sst [smem:[#allocation11_spill]] %s4817_s3 }
   0x5   :  { %4845 = sst [smem:[#allocation12_spill]] %s4818_s4 }
   0x6   :  { %4846 = sst [smem:[#allocation13_spill]] %s4819_s5 }
   0x7   :  { %s4847_s26 = sld [smem:[#allocation9_spill]]  ;;  %vm94_vm0 = vcmask 1043456   ;;  %vm87_vm1 = vcmask 162816  }
   0x8   :  { %s4848_s0 = sld [smem:[#allocation8_spill]] }
   0xd   :  { %v86_v0 = vld [vmem:[%s4847_s26 + $0x10] sm:$0xf]  ;;  %v85_v1 = vld [vmem:[%s4847_s26 + $0x8] sm:$0xff]  ;;  %v84_v3 = vld [vmem:[%s4847_s26] sm:$0xff] }
   0xe   :  { %3173 = vmatprep.subr.msk.mxu0 %vm94_vm0, %v86_v0  ;;  %v82_v2 = vld [vmem:[%s4848_s0] sm:$0xff] }
   0xf   :  { %3174 = vmatpush3.msk.msra.mxu0 %vm94_vm0, %v86_v0  ;;  %3179 = vmatprep.mubr.msk.f32.mxu0 %vm87_vm1, %v82_v2 }
  0x10   :  { %3175 = vmatprep.subr.mxu0 %v85_v1 }
  0x11   :  { %26 = vsyncpa [#allocation6], 0  ;;  %3176 = vmatpush3.msra.mxu0 %v85_v1  ;;  %v83_v4 = vld [vmem:[%s4848_s0 + $0x8] sm:$0xff]  ;;  %s4849_s24 = sld [smem:[#allocation11_spill]]  ;;  %vm178_vm2 = vcmask 64512   ;;  %v3511_v10 = vmov 0.0  }
  0x12   :  { %3177 = vmatprep.subr.mxu0 %v84_v3  ;;  %s4850_s27 = sld [smem:[#allocation10_spill]]  ;;  %70 = vst [vmem:[#allocation2 + $0x8] sm:$0xff] %v3511_v10  ;;  %69 = vst [vmem:[#allocation2] sm:$0xff] %v3511_v10  ;;  %vm335_vm3 = vcmask 130048   ;;  %vm465_vm4 = vcmask 261120   ;;  %s3512_s25 = smov 64  }
  0x13   :  { %3178 = vmatpush3.msra.mxu0 %v84_v3  ;;  %71 = vst [vmem:[#allocation2 + $0x10] sm:$0xff] %v3511_v10  ;;  %72 = vst [vmem:[#allocation2 + $0x18] sm:$0xff] %v3511_v10  ;;  %s4851_s22 = sld [smem:[#allocation12_spill]]  ;;  %v510_v25 = vld [vmem:[%s4823_s9 + $0x78] sm:$0xff]  ;;  %v509_v26 = vld [vmem:[%s4823_s9 + $0x70] sm:$0xff]  ;;  %vm330_vm5 = vcmask 654848  }
  0x14   :  { %3180 = vmatmul.mubr.msk.f32.vlgmr.msra.gmra.mxu0 %vm87_vm1, %v83_v4  ;;  %73 = vst [vmem:[#allocation3] sm:$0xff] %v3511_v10  ;;  %74 = vst [vmem:[#allocation3 + $0x8] sm:$0xff] %v3511_v10  ;;  %3206 = vmatprep.subr.mxu1 %v510_v25  ;;  %v508_v27 = vld [vmem:[%s4823_s9 + $0x68] sm:$0xff]  ;;  %v507_v28 = vld [vmem:[%s4823_s9 + $0x60] sm:$0xff]  ;;  %s3513_s28 = smov 32   ;;  %vm486_vm6 = vcmask 523520  }
  0x15   :  { %75 = vst [vmem:[#allocation3 + $0x10] sm:$0xff] %v3511_v10  ;;  %76 = vst [vmem:[#allocation3 + $0x18] sm:$0xff] %v3511_v10  ;;  %3207 = vmatpush3.msra.mxu1 %v510_v25  ;;  %v506_v29 = vld [vmem:[%s4823_s9 + $0x58] sm:$0xff]  ;;  %v505_v30 = vld [vmem:[%s4823_s9 + $0x50] sm:$0xff]  ;;  %s4852_s4 = sld [smem:[#allocation13_spill]]  ;;  %v3514_v0 = vmov 0  }
  0x16   :  { %77 = vst [vmem:[#allocation3 + $0x20] sm:$0xff] %v3511_v10  ;;  %78 = vst [vmem:[#allocation3 + $0x28] sm:$0xff] %v3511_v10  ;;  %3208 = vmatprep.subr.mxu1 %v509_v26  ;;  %v504_v31 = vld [vmem:[%s4823_s9 + $0x48] sm:$0xff]  ;;  %v503_v32 = vld [vmem:[%s4823_s9 + $0x40] sm:$0xff]  ;;  %3459 = vset.pattern.permute.xlu1 %v3514_v0 }
  0x17   :  { %v177_v5 = vld [vmem:[%s4849_s24] sm:$0xff]  ;;  %79 = vst [vmem:[#allocation3 + $0x30] sm:$0xff] %v3511_v10  ;;  %80 = vst [vmem:[#allocation3 + $0x38] sm:$0xff] %v3511_v10  ;;  %3209 = vmatpush3.msra.mxu1 %v509_v26  ;;  %v502_v33 = vld [vmem:[%s4823_s9 + $0x38] sm:$0xff]  ;;  %3458 = vset.pattern.permute.xlu0 %v3514_v0 }
  0x18   :  { %v173_v6 = vld [vmem:[%s4850_s27] sm:$0xff]  ;;  %3182 = vmatprep.subr.mxu0 %v177_v5  ;;  %v174_v7 = vld [vmem:[%s4850_s27 + $0x8] sm:$0xff]  ;;  %v175_v8 = vld [vmem:[%s4850_s27 + $0x10] sm:$0xff]  ;;  %81 = vst [vmem:[#allocation4] sm:$0x3] %v3511_v10  ;;  %3210 = vmatprep.subr.mxu1 %v508_v27 }
  0x19   :  { %3183 = vmatpush3.msra.mxu0 %v177_v5  ;;  %3184 = vmatprep.mubr.msk.f32.mxu0 %vm178_vm2, %v173_v6  ;;  %v176_v9 = vld [vmem:[%s4850_s27 + $0x18] sm:$0xff]  ;;  %v276_v11 = vld [vmem:[%s4851_s22] sm:$0xff]  ;;  %v277_v14 = vld [vmem:[%s4851_s22 + $0x8] sm:$0xff]  ;;  %s3515_s27 = smov 96  }
  0x1a   :  { %3185 = vmatmul.mubr.msk.f32.vlgmr.msra.gmra.mxu0 %vm178_vm2, %v174_v7  ;;  %v278_v15 = vld [vmem:[%s4851_s22 + $0x10] sm:$0xff]  ;;  %v279_v17 = vld [vmem:[%s4851_s22 + $0x18] sm:$0xff]  ;;  %v280_v19 = vld [vmem:[%s4851_s22 + $0x20] sm:$0xff]  ;;  %3211 = vmatpush3.msra.mxu1 %v508_v27 }
  0x1b   :  { %3187 = vmatprep.mubr.msk.f32.mxu0 %vm178_vm2, %v175_v8  ;;  %v281_v21 = vld [vmem:[%s4851_s22 + $0x28] sm:$0xff]  ;;  %v282_v23 = vld [vmem:[%s4851_s22 + $0x30] sm:$0xff]  ;;  %v283_v24 = vld [vmem:[%s4851_s22 + $0x38] sm:$0xff]  ;;  %3212 = vmatprep.subr.mxu1 %v507_v28 }
  0x1c   :  { %3213 = vmatpush3.msra.mxu1 %v507_v28  ;;  %v501_v34 = vld [vmem:[%s4823_s9 + $0x30] sm:$0xff]  ;;  %v500_v38 = vld [vmem:[%s4823_s9 + $0x28] sm:$0xff]  ;;  %v499_v39 = vld [vmem:[%s4823_s9 + $0x20] sm:$0xff] }
  0x1d   :  { %3214 = vmatprep.subr.mxu1 %v506_v29  ;;  %v498_v41 = vld [vmem:[%s4823_s9 + $0x18] sm:$0xff]  ;;  %v497_v42 = vld [vmem:[%s4823_s9 + $0x10] sm:$0xff]  ;;  %v496_v45 = vld [vmem:[%s4823_s9 + $0x8] sm:$0xff] }
  0x1e   :  { %3188 = vmatmul.mubr.msk.f32.gmra.mxu0 %vm178_vm2, %v176_v9  ;;  %3215 = vmatpush3.msra.mxu1 %v506_v29  ;;  %v495_v46 = vld [vmem:[%s4823_s9] sm:$0xff]  ;;  %v291_v63 = vld [vmem:[%s4821_s7 + $0x8] sm:$0xff] }
  0x1f   :  { %3194 = vmatprep.mubr.msk.f32.mxu0 %vm335_vm3, %v276_v11  ;;  %3216 = vmatprep.subr.mxu1 %v505_v30  ;;  %v3789_v61 = vld [vmem:[%s4852_s4] sm:$0xff]  ;;  %v295_v2 = vmax.f32 %v291_v63, 1.0  ;;  %vm313_vm9 = vcmp.gt.f32.partialorder %v291_v63, 0.0  ;;  %v299_v7 = vadd.f32 1.0, %v291_v63  ;;  %vm879_vm10 = vcmp.gt.f32.partialorder %v291_v63, 1.0  ;;  %v1096_v63 = vld [vmem:[%s4825_s11 + $0x70] sm:$0xff] }
  0x20   :  { %3217 = vmatpush3.msra.mxu1 %v505_v30  ;;  %v290_v62 = vld [vmem:[%s4821_s7] sm:$0xff]  ;;  %v861_v6 = vsel %vm313_vm9, 1, %v3514_v0  ;;  %v881_v8 = vsel %vm879_vm10, 1, %v3514_v0 }
  0x21   :  { %3218 = vmatprep.subr.mxu1 %v504_v31  ;;  %v294_v1 = vmax.f32 %v290_v62, 1.0  ;;  %vm878_vm7 = vcmp.gt.f32.partialorder %v290_v62, 1.0  ;;  %vm312_vm8 = vcmp.gt.f32.partialorder %v290_v62, 0.0  ;;  %v298_v5 = vadd.f32 1.0, %v290_v62  ;;  %v2745_v28 = vld [vmem:[%s4824_s10] ss:$0 sm:$0xff] }
  0x22   :  { %3219 = vmatpush3.msra.mxu1 %v504_v31  ;;  %v880_v3 = vsel %vm878_vm7, 1, %v3514_v0  ;;  %v860_v4 = vsel %vm312_vm8, 1, %v3514_v0  ;;  %v1112_v62 = vld [vmem:[%s4825_s11 + $0xf0] sm:$0xff]  ;;  %v1145_v0 = vld [vmem:[%s4825_s11 + $0x1f8] sm:$0xff]  ;;  %vm1037_vm7 = vcmask 1048320  }
  0x23   :  { %3220 = vmatprep.subr.mxu1 %v503_v32  ;;  %3460 = vrcp.f32 %v294_v1  ;;  %v1111_v1 = vld [vmem:[%s4825_s11 + $0xe8] sm:$0xff] }
  0x24   :  { %3221 = vmatpush3.msra.mxu1 %v503_v32  ;;  %3462 = vrcp.f32 %v295_v2  ;;  %v1129_v2 = vld [vmem:[%s4825_s11 + $0x178] sm:$0xff] }
  0x25   :  { %3222 = vmatprep.subr.mxu1 %v502_v33  ;;  %3464 = vlog2.f32 %v298_v5  ;;  %v1144_v5 = vld [vmem:[%s4825_s11 + $0x1f0] sm:$0xff] }
  0x26   :  { %3223 = vmatpush3.msra.mxu1 %v502_v33  ;;  %3466 = vlog2.f32 %v299_v7  ;;  %v1110_v7 = vld [vmem:[%s4825_s11 + $0xe0] sm:$0xff] }
  0x27   :  { %3224 = vmatprep.subr.mxu1 %v501_v34 }
  0x28   :  { %3225 = vmatpush3.msra.mxu1 %v501_v34 }
  0x29   :  { %3226 = vmatprep.subr.mxu1 %v500_v38 }
  0x2a   :  { %3227 = vmatpush3.msra.mxu1 %v500_v38 }
  0x2b   :  { %3228 = vmatprep.subr.mxu1 %v499_v39 }
  0x2c   :  { %3229 = vmatpush3.msra.mxu1 %v499_v39 }
  0x2d   :  { %3230 = vmatprep.subr.mxu1 %v498_v41 }
  0x2e   :  { %3231 = vmatpush3.msra.mxu1 %v498_v41  ;;  %v3823_v41 = vld [vmem:[%s4820_s6 + $0x8] sm:$0xff] }
  0x2f   :  { %3232 = vmatprep.subr.mxu1 %v497_v42 }
  0x30   :  { %3233 = vmatpush3.msra.mxu1 %v497_v42  ;;  %v3461_v9 = vpop.eup %3460  ;;  %v3828_v42 = vld [vmem:[%s4820_s6 + $0x10] sm:$0xff] }
  0x31   :  { %3234 = vmatprep.subr.mxu1 %v496_v45  ;;  %v3463_v11 = vpop.eup %3462 }
  0x32   :  { %3235 = vmatpush3.msra.mxu1 %v496_v45 }
  0x33   :  { %3236 = vmatprep.subr.mxu1 %v495_v46 }
  0x34   :  { %3237 = vmatpush3.msra.mxu1 %v495_v46 }
  0xd4   :  { %v3675_v12 = vpop.f32.mrf.mxu0 }
  0xd5   :  { %3190 = vmatprep.subr.mxu0 %v3675_v12  ;;  %939 = vst.msk [vmem:[#allocation3 + $0x20] sm:$0xff] %vm465_vm4, %v3675_v12 }
  0xd6   :  { %v3680_v13 = vpop.f32.mrf.mxu0  ;;  %3191 = vmatpush3.msra.mxu0 %v3675_v12 }
  0xd7   :  { %3192 = vmatprep.subr.mxu0 %v3680_v13  ;;  %938 = vst.msk [vmem:[#allocation3] sm:$0xff] %vm465_vm4, %v3680_v13 }
  0xd8   :  { %3193 = vmatpush3.msra.mxu0 %v3680_v13 }
  0xd9   :  { %3195 = vmatmul.mubr.msk.f32.vlgmr.msra.gmra.mxu0 %vm335_vm3, %v277_v14  ;;  %v3465_v14 = vpop.eup %3464 }
  0xda   :  { %v3186_v16 = vpop.f32.mrf.mxu0  ;;  %3197 = vmatprep.mubr.msk.f32.mxu0 %vm335_vm3, %v278_v15  ;;  %v3467_v15 = vpop.eup %3466 }
  0xdb   :  { %320 = vrot.lane.b32.xlu0 %v3186_v16, %s3512_s25  ;;  %v301_v16 = vmul.f32 0.6931472, %v3465_v14  ;;  %v1094_v14 = vld [vmem:[%s4825_s11 + $0x60] sm:$0xff] }
  0xdc   :  { %v257_v18 = vpop.f32.mrf.mxu0 }
  0xdd   :  { %3198 = vmatmul.mubr.msk.f32.gmra.mxu0 %vm335_vm3, %v279_v17  ;;  %v303_v17 = vmul.f32 0.6931472, %v3467_v15 }
  0xde   :  { %v3702_v20 = vpop.f32.mrf.mxu0  ;;  %3200 = vmatprep.mubr.msk.f32.mxu0 %vm335_vm3, %v280_v19  ;;  %v306_v19 = vmax.f32 %v301_v16, 1e-05 }
  0xdf   :  { %318 = vrot.lane.b32.xlu0 %v257_v18, %s3512_s25  ;;  %v304_v18 = vmul.f32 0.9102392, %v301_v16 }
  0xe0   :  { %v267_v22 = vpop.f32.mrf.mxu0  ;;  %3468 = vrcp.f32 %v306_v19 }
  0xe1   :  { %3201 = vmatmul.mubr.msk.f32.gmra.mxu0 %vm335_vm3, %v281_v21  ;;  %v307_v21 = vmax.f32 %v303_v17, 1e-05 }
  0xe2   :  { %3203 = vmatprep.mubr.msk.f32.mxu0 %vm335_vm3, %v282_v23 }
  0xe3   :  { %322 = vrot.lane.b32.xlu0 %v267_v22, %s3512_s25  ;;  %3470 = vrcp.f32 %v307_v21  ;;  %v1143_v21 = vld [vmem:[%s4825_s11 + $0x1e8] sm:$0xff] }
  0xe5   :  { %3204 = vmatmul.mubr.msk.f32.gmra.mxu0 %vm335_vm3, %v283_v24 }
  0xe6   :  { %3252 = vmatprep.mubr.msk.f32.mxu0 %vm465_vm4, %v3789_v61 }
  0xed   :  { %v3469_v22 = vpop.eup %3468 }
  0xee   :  { %v310_v24 = vmul.f32 1.0986123, %v3469_v22  ;;  %v1093_v22 = vld [vmem:[%s4825_s11 + $0x58] sm:$0xff] }
  0xf0   :  { %v3471_v23 = vpop.eup %3470 }
  0xf1   :  { %v311_v25 = vmul.f32 1.0986123, %v3471_v23 }
 0x14d   :  { %v321_v35 = vpop.permute.xlu0 %320 }
 0x14e   :  { %332 = vst.msk [vmem:[#allocation2 + $0x8] sm:$0xff] %vm330_vm5, %v321_v35  ;;  %v3805_v35 = vld [vmem:[%s4852_s4 + $0x8] sm:$0xff] }
 0x151   :  { %v319_v36 = vpop.permute.xlu0 %318 }
 0x152   :  { %331 = vst.msk [vmem:[#allocation2] sm:$0xff] %vm330_vm5, %v319_v36 }
 0x155   :  { %v323_v37 = vpop.permute.xlu0 %322 }
 0x156   :  { %333 = vst.msk [vmem:[#allocation2 + $0x10] sm:$0xff] %vm330_vm5, %v323_v37 }
 0x199   :  { %v3196_v40 = vpop.f32.mrf.mxu0 }
 0x19a   :  { %467 = vst.msk [vmem:[#allocation2 + $0x8] sm:$0xff] %vm465_vm4, %v3196_v40  ;;  %v3814_v40 = vld [vmem:[%s4820_s6] sm:$0xff] }
 0x19b   :  { %v426_v43 = vpop.f32.mrf.mxu0 }
 0x19c   :  { %466 = vst.msk [vmem:[#allocation2] sm:$0xff] %vm465_vm4, %v426_v43  ;;  %v3837_v43 = vld [vmem:[%s4820_s6 + $0x18] sm:$0xff] }
 0x19d   :  { %v3199_v44 = vpop.f32.mrf.mxu0 }
 0x19f   :  { %v436_v47 = vpop.f32.mrf.mxu0 }
 0x1a0   :  { %468 = vst.msk [vmem:[#allocation2 + $0x10] sm:$0xff] %vm465_vm4, %v436_v47 }
 0x1a1   :  { %v3202_v48 = vpop.f32.mrf.mxu0 }
 0x1a2   :  { %476 = vrot.lane.b32.xlu1 %v3202_v48, %s3513_s28 }
 0x1a3   :  { %v446_v49 = vpop.f32.mrf.mxu0 }
 0x1a5   :  { %v3205_v50 = vpop.f32.mrf.mxu0 }
 0x1a6   :  { %474 = vrot.lane.b32.xlu1 %v446_v49, %s3513_s28 }
 0x1a7   :  { %v456_v51 = vpop.f32.mrf.mxu0 }
 0x1a8   :  { %478 = vrot.lane.b32.xlu0 %v456_v51, %s3513_s28 }
 0x1aa   :  { %324 = vrot.lane.b32.xlu1 %v3702_v20, %s3512_s25  ;;  %v305_v20 = vmul.f32 0.9102392, %v303_v17 }
 0x1ac   :  { %863 = vperm.xlu0 %3458, %v860_v4   ;;  %v1095_v4 = vld [vmem:[%s4825_s11 + $0x68] sm:$0xff] }
 0x1ae   :  { %480 = vrot.lane.b32.xlu1 %v3205_v50, %s3513_s28 }
 0x1b0   :  { %904 = vperm.xlu0 %3458, %v3461_v9  }
 0x1b2   :  { %883 = vperm.xlu1 %3459, %v880_v3  }
 0x1b4   :  { %952 = vperm.xlu0 %3458, %v304_v18  }
 0x1b6   :  { %866 = vperm.xlu1 %3459, %v861_v6  }
 0x1b8   :  { %974 = vperm.xlu0 %3458, %v310_v24  }
 0x1ba   :  { %886 = vperm.xlu1 %3459, %v881_v8   ;;  %v1128_v8 = vld [vmem:[%s4825_s11 + $0x170] sm:$0xff] }
 0x1bc   :  { %979 = vperm.xlu0 %3458, %v311_v25   ;;  %v1127_v25 = vld [vmem:[%s4825_s11 + $0x168] sm:$0xff] }
 0x1be   :  { %909 = vperm.xlu1 %3459, %v3463_v11  }
 0x1c2   :  { %957 = vperm.xlu1 %3459, %v305_v20   ;;  %v1109_v20 = vld [vmem:[%s4825_s11 + $0xd8] sm:$0xff] }
 0x214   :  { %v477_v52 = vpop.permute.xlu1 %476 }
 0x215   :  { %488 = vst.msk [vmem:[#allocation2 + $0x8] sm:$0xff] %vm486_vm6, %v477_v52 }
 0x218   :  { %v475_v53 = vpop.permute.xlu1 %474 }
 0x219   :  { %487 = vst.msk [vmem:[#allocation2] sm:$0xff] %vm486_vm6, %v475_v53 }
 0x21a   :  { %v479_v54 = vpop.permute.xlu0 %478 }
 0x21b   :  { %489 = vst.msk [vmem:[#allocation2 + $0x10] sm:$0xff] %vm486_vm6, %v479_v54 }
 0x21c   :  { %v325_v55 = vpop.permute.xlu1 %324  ;;  %v492_v58 = vld [vmem:[#allocation2 + $0x8] sm:$0xff] }
 0x21d   :  { %334 = vst.msk [vmem:[#allocation2 + $0x18] sm:$0xff] %vm330_vm5, %v325_v55  ;;  %vm1002_vm5 = vcmask 785920  }
 0x21e   :  { %469 = vst.msk [vmem:[#allocation2 + $0x18] sm:$0xff] %vm465_vm4, %v3199_v44 }
 0x220   :  { %v481_v56 = vpop.permute.xlu1 %480  ;;  %v491_v57 = vld [vmem:[#allocation2] sm:$0xff] }
 0x221   :  { %490 = vst.msk [vmem:[#allocation2 + $0x18] sm:$0xff] %vm486_vm6, %v481_v56  ;;  %3238 = vmatprep.mubr.f32.mxu1 %v491_v57 }
 0x222   :  { %3239 = vmatmul.mubr.f32.vlgmr.msra.gmra.mxu1 %v492_v58  ;;  %v493_v59 = vld [vmem:[#allocation2 + $0x10] sm:$0xff] }
 0x223   :  { %3241 = vmatprep.mubr.f32.mxu1 %v493_v59  ;;  %v1113_v59 = vld [vmem:[%s4825_s11 + $0xf8] sm:$0xff] }
 0x224   :  { %2931 = vmatprep.subr.mxu1 %v1113_v59  ;;  %v1140_v59 = vld [vmem:[%s4825_s11 + $0x1d0] sm:$0xff] }
 0x227   :  { %v3841_v44 = vpop.permute.xlu0 %863 }
 0x228   :  { %v494_v60 = vld [vmem:[#allocation2 + $0x18] sm:$0xff]  ;;  %vm868_vm12 = vcmp.eq.s32.totalorder %v3841_v44, 1  ;;  %v2796_v44 = vld [vmem:[%s4825_s11 + $0x220] sm:$0xff] }
 0x229   :  { %3242 = vmatmul.mubr.f32.gmra.mxu1 %v494_v60  ;;  %v1097_v60 = vld [vmem:[%s4825_s11 + $0x78] sm:$0xff] }
 0x22a   :  { %2932 = vmatpush3.msra.mxu1 %v1097_v60  ;;  %v1090_v60 = vld [vmem:[%s4825_s11 + $0x40] sm:$0xff] }
 0x22b   :  { %v3845_v46 = vpop.permute.xlu0 %904  ;;  %2933 = vmatprep.subr.mxu1 %v1112_v62  ;;  %v1124_v62 = vld [vmem:[%s4825_s11 + $0x150] sm:$0xff] }
 0x22c   :  { %2934 = vmatpush3.msra.mxu1 %v1096_v63 }
 0x22d   :  { %v3843_v45 = vpop.permute.xlu1 %883  ;;  %2935 = vmatprep.subr.mxu1 %v1111_v1 }
 0x22e   :  { %2936 = vmatpush3.msra.mxu1 %v1095_v4  ;;  %vm888_vm14 = vcmp.eq.s32.totalorder %v3843_v45, 1  ;;  %v2848_v45 = vld [vmem:[%s4825_s11 + $0x3c0] sm:$0xff] }
 0x22f   :  { %v3849_v48 = vpop.permute.xlu0 %952  ;;  %2937 = vmatprep.subr.mxu1 %v1110_v7 }
 0x230   :  { %2938 = vmatpush3.msra.mxu1 %v1094_v14  ;;  %v1089_v14 = vld [vmem:[%s4825_s11 + $0x38] sm:$0xff] }
 0x231   :  { %v3847_v47 = vpop.permute.xlu1 %866  ;;  %2939 = vmatprep.subr.mxu1 %v1109_v20 }
 0x232   :  { %2940 = vmatpush3.msra.mxu1 %v1093_v22  ;;  %vm869_vm11 = vcmp.eq.s32.totalorder %v3847_v47, 1  ;;  %v2846_v47 = vld [vmem:[%s4825_s11 + $0x3b0] sm:$0xff] }
 0x233   :  { %v3853_v50 = vpop.permute.xlu0 %974 }
 0x235   :  { %v3851_v49 = vpop.permute.xlu1 %886 }
 0x236   :  { %vm889_vm13 = vcmp.eq.s32.totalorder %v3851_v49, 1 }
 0x237   :  { %v3857_v53 = vpop.permute.xlu0 %979 }
 0x239   :  { %v3855_v51 = vpop.permute.xlu1 %909 }
 0x23d   :  { %v3863_v58 = vpop.permute.xlu1 %957 }
 0x2e2   :  { %v3240_v26 = vpop.f32.mrf.mxu1 }
 0x2e3   :  { %v590_v33 = vadd.f32 %v3240_v26, %v2745_v28  ;;  %v1108_v26 = vld [vmem:[%s4825_s11 + $0xd0] sm:$0xff] }
 0x2e4   :  { %v584_v27 = vpop.f32.mrf.mxu1  ;;  %2941 = vmatprep.subr.mxu1 %v1108_v26  ;;  %v1103_v26 = vld [vmem:[%s4825_s11 + $0xa8] sm:$0xff] }
 0x2e5   :  { %v585_v34 = vadd.f32 %v2745_v28, %v584_v27  ;;  %v685_v38 = vmul.f32 %v590_v33, %v590_v33  ;;  %v1142_v27 = vld [vmem:[%s4825_s11 + $0x1e0] sm:$0xff] }
 0x2e7   :  { %v684_v39 = vmul.f32 %v585_v34, %v585_v34 }
 0x2e9   :  { %v3243_v29 = vpop.f32.mrf.mxu1 }
 0x2ea   :  { %v600_v30 = vadd.f32 %v3243_v29, %v2745_v28 }
 0x2eb   :  { %v594_v31 = vpop.f32.mrf.mxu1 }
 0x2ec   :  { %v595_v32 = vadd.f32 %v2745_v28, %v594_v31  ;;  %3244 = vmatprep.subr.mxu0 %v600_v30  ;;  %v687_v36 = vmul.f32 %v600_v30, %v600_v30  ;;  %v1092_v28 = vld [vmem:[%s4825_s11 + $0x50] sm:$0xff] }
 0x2ed   :  { %3245 = vmatpush3.msra.mxu0 %v600_v30  ;;  %2942 = vmatpush3.msra.mxu1 %v1092_v28  ;;  %v1137_v28 = vld [vmem:[%s4825_s11 + $0x1b8] sm:$0xff] }
 0x2ee   :  { %3246 = vmatprep.subr.mxu0 %v595_v32  ;;  %v686_v37 = vmul.f32 %v595_v32, %v595_v32 }
 0x2ef   :  { %3247 = vmatpush3.msra.mxu0 %v595_v32 }
 0x2f0   :  { %3248 = vmatprep.subr.mxu0 %v590_v33 }
 0x2f1   :  { %3249 = vmatpush3.msra.mxu0 %v590_v33 }
 0x2f2   :  { %3250 = vmatprep.subr.mxu0 %v585_v34 }
 0x2f3   :  { %3251 = vmatpush3.msra.mxu0 %v585_v34 }
 0x2f4   :  { %3253 = vmatmul.mubr.msk.f32.vlgmr.msra.gmra.mxu0 %vm465_vm4, %v3805_v35  ;;  %3255 = vmatprep.subr.mxu0 %v687_v36 }
 0x2f5   :  { %3256 = vmatpush3.msra.mxu0 %v687_v36  ;;  %3263 = vmatprep.mubr.msk.f32.mxu0 %vm465_vm4, %v3789_v61  ;;  %v1141_v36 = vld [vmem:[%s4825_s11 + $0x1d8] sm:$0xff] }
 0x2f6   :  { %3257 = vmatprep.subr.mxu0 %v686_v37 }
 0x2f7   :  { %3258 = vmatpush3.msra.mxu0 %v686_v37  ;;  %v1091_v37 = vld [vmem:[%s4825_s11 + $0x48] sm:$0xff] }
 0x2f8   :  { %3259 = vmatprep.subr.mxu0 %v685_v38 }
 0x2f9   :  { %3260 = vmatpush3.msra.mxu0 %v685_v38 }
 0x2fa   :  { %3261 = vmatprep.subr.mxu0 %v684_v39 }
 0x2fb   :  { %3262 = vmatpush3.msra.mxu0 %v684_v39 }
 0x2fc   :  { %3264 = vmatmul.mubr.msk.f32.vlgmr.msra.gmra.mxu0 %vm465_vm4, %v3805_v35  ;;  %3266 = vmatprep.subr.mxu0 %v600_v30 }
 0x2fd   :  { %3267 = vmatpush3.msra.mxu0 %v600_v30  ;;  %3274 = vmatprep.mubr.msk.f32.mxu0 %vm465_vm4, %v3814_v40 }
 0x2fe   :  { %3268 = vmatprep.subr.mxu0 %v595_v32 }
 0x2ff   :  { %3269 = vmatpush3.msra.mxu0 %v595_v32  ;;  %v1126_v32 = vld [vmem:[%s4825_s11 + $0x160] sm:$0xff] }
 0x300   :  { %3270 = vmatprep.subr.mxu0 %v590_v33 }
 0x301   :  { %3271 = vmatpush3.msra.mxu0 %v590_v33 }
 0x302   :  { %3272 = vmatprep.subr.mxu0 %v585_v34 }
 0x303   :  { %3273 = vmatpush3.msra.mxu0 %v585_v34  ;;  %v1107_v34 = vld [vmem:[%s4825_s11 + $0xc8] sm:$0xff] }
 0x304   :  { %3275 = vmatmul.mubr.msk.f32.vlgmr.msra.gmra.mxu0 %vm465_vm4, %v3823_v41  ;;  %2969 = vmatprep.subr.mxu0 %v1145_v0 }
 0x305   :  { %3277 = vmatprep.mubr.msk.f32.mxu0 %vm465_vm4, %v3828_v42  ;;  %2970 = vmatpush3.msra.mxu0 %v1129_v2 }
 0x306   :  { %2971 = vmatprep.subr.mxu0 %v1144_v5  ;;  %2943 = vmatprep.subr.mxu1 %v1107_v34  ;;  %v1102_v34 = vld [vmem:[%s4825_s11 + $0xa0] sm:$0xff] }
 0x307   :  { %2972 = vmatpush3.msra.mxu0 %v1128_v8  ;;  %2944 = vmatpush3.msra.mxu1 %v1091_v37  ;;  %v1136_v37 = vld [vmem:[%s4825_s11 + $0x1b0] sm:$0xff] }
 0x308   :  { %3278 = vmatmul.mubr.msk.f32.gmra.mxu0 %vm465_vm4, %v3837_v43  ;;  %2973 = vmatprep.subr.mxu0 %v1143_v21 }
 0x309   :  { %2974 = vmatpush3.msra.mxu0 %v1127_v25  ;;  %v1122_v25 = vld [vmem:[%s4825_s11 + $0x140] sm:$0xff] }
 0x30a   :  { %2975 = vmatprep.subr.mxu0 %v1142_v27 }
 0x30b   :  { %2976 = vmatpush3.msra.mxu0 %v1126_v32 }
 0x30c   :  { %2977 = vmatprep.subr.mxu0 %v1141_v36 }
 0x3b4   :  { %v3254_v52 = vpop.f32.mrf.mxu0 }
 0x3b5   :  { %v913_v54 = vmul.f32 %v3254_v52, %v3855_v51 }
 0x3b6   :  { %v675_v55 = vpop.f32.mrf.mxu0 }
 0x3b7   :  { %v912_v56 = vmul.f32 %v3845_v46, %v675_v55  ;;  %944 = vrot.lane.b32.xlu0 %v913_v54, %s3513_s28  ;;  %v983_v57 = vmul.f32 %v3857_v53, %v913_v54  ;;  %v961_v3 = vmul.f32 %v3863_v58, %v913_v54  ;;  %v917_v11 = vmul.f32 %v913_v54, %v913_v54  ;;  %v1125_v55 = vld [vmem:[%s4825_s11 + $0x158] sm:$0xff] }
 0x3b8   :  { %2978 = vmatpush3.msra.mxu0 %v1125_v55 }
 0x3b9   :  { %942 = vrot.lane.b32.xlu1 %v912_v56, %s3513_s28  ;;  %v916_v16 = vmul.f32 %v912_v56, %v912_v56  ;;  %v960_v19 = vmul.f32 %v3849_v48, %v912_v56  ;;  %v982_v31 = vmul.f32 %v3853_v50, %v912_v56  ;;  %v1106_v56 = vld [vmem:[%s4825_s11 + $0xc0] sm:$0xff]  ;;  %2979 = vmatprep.subr.mxu0 %v1140_v59  ;;  %v1135_v59 = vld [vmem:[%s4825_s11 + $0x1a8] sm:$0xff] }
 0x3ba   :  { %2945 = vmatprep.subr.mxu1 %v1106_v56  ;;  %2980 = vmatpush3.msra.mxu0 %v1124_v62 }
 0x3bb   :  { %988 = vrot.lane.b32.xlu0 %v983_v57, %s3513_s28  ;;  %2946 = vmatpush3.msra.mxu1 %v1090_v60 }
 0x3bc   :  { %v3265_v6 = vpop.f32.mrf.mxu0 }
 0x3bd   :  { %v915_v9 = vmul.f32 %v3265_v6, %v3855_v51  ;;  %966 = vrot.lane.b32.xlu1 %v961_v3, %s3513_s28 }
 0x3be   :  { %v754_v15 = vpop.f32.mrf.mxu0 }
 0x3bf   :  { %v919_v17 = vsub.f32 %v915_v9, %v917_v11  ;;  %v914_v18 = vmul.f32 %v3845_v46, %v754_v15  ;;  %v1105_v9 = vld [vmem:[%s4825_s11 + $0xb8] sm:$0xff]  ;;  %v1139_v11 = vld [vmem:[%s4825_s11 + $0x1c8] sm:$0xff] }
 0x3c0   :  { %2947 = vmatprep.subr.mxu1 %v1105_v9  ;;  %2981 = vmatprep.subr.mxu0 %v1139_v11  ;;  %v1084_v11 = vld [vmem:[%s4825_s11 + $0x10] sm:$0xff] }
 0x3c1   :  { %v921_v23 = vmax.f32 %v919_v17, 0.0  ;;  %v918_v24 = vsub.f32 %v914_v18, %v916_v16  ;;  %964 = vrot.lane.b32.xlu1 %v960_v19, %s3513_s28  ;;  %v1123_v17 = vld [vmem:[%s4825_s11 + $0x148] sm:$0xff]  ;;  %v1104_v18 = vld [vmem:[%s4825_s11 + $0xb0] sm:$0xff]  ;;  %2948 = vmatpush3.msra.mxu1 %v1089_v14  ;;  %v1118_v14 = vld [vmem:[%s4825_s11 + $0x120] sm:$0xff] }
 0x3c2   :  { %2982 = vmatpush3.msra.mxu0 %v1123_v17  ;;  %2949 = vmatprep.subr.mxu1 %v1104_v18  ;;  %v1133_v18 = vld [vmem:[%s4825_s11 + $0x198] sm:$0xff] }
 0x3c3   :  { %v3930_v29 = vadd.f32 1e-05, %v921_v23  ;;  %v920_v30 = vmax.f32 %v918_v24, 0.0  ;;  %v1138_v23 = vld [vmem:[%s4825_s11 + $0x1c0] sm:$0xff]  ;;  %v1088_v24 = vld [vmem:[%s4825_s11 + $0x30] sm:$0xff] }
 0x3c4   :  { %v3276_v33 = vpop.f32.mrf.mxu0  ;;  %2983 = vmatprep.subr.mxu0 %v1138_v23  ;;  %2950 = vmatpush3.msra.mxu1 %v1088_v24  ;;  %v1132_v23 = vld [vmem:[%s4825_s11 + $0x190] sm:$0xff]  ;;  %v1082_v24 = vld [vmem:[%s4825_s11] sm:$0xff] }
 0x3c5   :  { %3472 = vrsqrt.f32 %v3930_v29  ;;  %v3947_v38 = vadd.f32 1e-05, %v920_v30  ;;  %v871_v39 = vsel %vm869_vm11, %v3276_v33, -1e+30  ;;  %v875_v52 = vsel %vm869_vm11, %v3276_v33, 1e+30  ;;  %986 = vrot.lane.b32.xlu1 %v982_v31, %s3513_s28  ;;  %2984 = vmatpush3.msra.mxu0 %v1122_v25 }
 0x3c6   :  { %v841_v54 = vpop.f32.mrf.mxu0  ;;  %v873_v57 = vmax.f32 %v871_v39, -1e+30  ;;  %v877_v63 = vmin.f32 %v875_v52, 1e+30  ;;  %v1087_v30 = vld [vmem:[%s4825_s11 + $0x28] sm:$0xff]  ;;  %v1121_v31 = vld [vmem:[%s4825_s11 + $0x138] sm:$0xff]  ;;  %2951 = vmatprep.subr.mxu1 %v1103_v26  ;;  %2985 = vmatprep.subr.mxu0 %v1137_v28 }
 0x3c7   :  { %3474 = vrsqrt.f32 %v3947_v38  ;;  %v870_v0 = vsel %vm868_vm12, %v841_v54, -1e+30  ;;  %v874_v1 = vsel %vm868_vm12, %v841_v54, 1e+30  ;;  %v1086_v39 = vld [vmem:[%s4825_s11 + $0x20] sm:$0xff]  ;;  %2952 = vmatpush3.msra.mxu1 %v1087_v30  ;;  %2986 = vmatpush3.msra.mxu0 %v1121_v31  ;;  %v1120_v54 = vld [vmem:[%s4825_s11 + $0x130] sm:$0xff] }
 0x3c8   :  { %v3279_v2 = vpop.f32.mrf.mxu0  ;;  %v872_v3 = vmax.f32 %v870_v0, -1e+30  ;;  %v876_v4 = vmin.f32 %v874_v1, 1e+30  ;;  %2953 = vmatprep.subr.mxu1 %v1102_v34  ;;  %vm933_vm15 = vcmp.eq.f32.partialorder %v3930_v29, inf  ;;  %v936_v62 = vand.u32 2147483648, %v3930_v29  ;;  %2987 = vmatprep.subr.mxu0 %v1136_v37 }
 0x3c9   :  { %v891_v5 = vsel %vm889_vm13, %v3279_v2, -1e+30  ;;  %v895_v7 = vsel %vm889_vm13, %v3279_v2, 1e+30  ;;  %2954 = vmatpush3.msra.mxu1 %v1086_v39  ;;  %vm935_vm0 = vcmp.eq.f32.partialorder %v3930_v29, 0.0  ;;  %2988 = vmatpush3.msra.mxu0 %v1120_v54  ;;  %vm926_vm1 = vcmp.eq.f32.partialorder %v3947_v38, inf }
 0x3ca   :  { %v893_v6 = vmax.f32 %v873_v57, %v891_v5  ;;  %v851_v8 = vpop.f32.mrf.mxu0  ;;  %v897_v19 = vmin.f32 %v877_v63, %v895_v7  ;;  %v1101_v57 = vld [vmem:[%s4825_s11 + $0x98] sm:$0xff]  ;;  %v929_v5 = vand.u32 2147483648, %v3947_v38  ;;  %2989 = vmatprep.subr.mxu0 %v1135_v59  ;;  %vm928_vm2 = vcmp.eq.f32.partialorder %v3947_v38, 0.0  ;;  %v1116_v26 = vld [vmem:[%s4825_s11 + $0x110] sm:$0xff]  ;;  %v292_v28 = vld [vmem:[%s4822_s8] sm:$0xff] }
 0x3cb   :  { %v890_v15 = vsel %vm888_vm14, %v851_v8, -1e+30  ;;  %v894_v16 = vsel %vm888_vm14, %v851_v8, 1e+30  ;;  %v1085_v63 = vld [vmem:[%s4825_s11 + $0x18] sm:$0xff]  ;;  %2955 = vmatprep.subr.mxu1 %v1101_v57  ;;  %v1131_v30 = vld [vmem:[%s4825_s11 + $0x188] sm:$0xff] }
 0x3cc   :  { %v892_v20 = vmax.f32 %v872_v3, %v890_v15  ;;  %v896_v21 = vmin.f32 %v876_v4, %v894_v16  ;;  %v4002_v22 = vsel %vm869_vm11, %v893_v6, 0.0  ;;  %v4035_v32 = vsel %vm869_vm11, %v897_v19, 0.0  ;;  %v1119_v3 = vld [vmem:[%s4825_s11 + $0x128] sm:$0xff]  ;;  %v1100_v4 = vld [vmem:[%s4825_s11 + $0x90] sm:$0xff]  ;;  %2956 = vmatpush3.msra.mxu1 %v1085_v63 }
 0x3cd   :  { %998 = vrot.lane.b32.xlu1 %v4002_v22, %s3512_s25  ;;  %v1006_v36 = vmul.f32 %v3863_v58, %v4002_v22  ;;  %v1041_v55 = vmul.f32 %v3863_v58, %v4035_v32  ;;  %2990 = vmatpush3.msra.mxu0 %v1119_v3  ;;  %v1083_v19 = vld [vmem:[%s4825_s11 + $0x8] sm:$0xff]  ;;  %v1018_v31 = vmul.f32 %v3857_v53, %v4002_v22 }
 0x3ce   :  { %v4020_v27 = vsel %vm868_vm12, %v892_v20, 0.0  ;;  %v900_v33 = vsel %vm868_vm12, %v896_v21, 0.0  ;;  %2957 = vmatprep.subr.mxu1 %v1100_v4  ;;  %v1117_v20 = vld [vmem:[%s4825_s11 + $0x118] sm:$0xff]  ;;  %v1098_v21 = vld [vmem:[%s4825_s11 + $0x80] sm:$0xff]  ;;  %v1053_v37 = vmul.f32 %v3857_v53, %v4035_v32  ;;  %v293_v22 = vld [vmem:[%s4822_s8 + $0x8] sm:$0xff]  ;;  %s3517_s8 = smov [#allocation5]  }
 0x3cf   :  { %996 = vrot.lane.b32.xlu0 %v4020_v27, %s3512_s25  ;;  %v1005_v1 = vmul.f32 %v3849_v48, %v4020_v27  ;;  %v1052_v8 = vmul.f32 %v3853_v50, %v900_v33  ;;  %v1040_v17 = vmul.f32 %v3849_v48, %v900_v33  ;;  %2958 = vmatpush3.msra.mxu1 %v1084_v11 }
 0x3d0   :  { %v1017_v25 = vmul.f32 %v3853_v50, %v4020_v27  ;;  %v1115_v27 = vld [vmem:[%s4825_s11 + $0x108] sm:$0xff] }
 0x3d1   :  { %1031 = vrot.lane.b32.xlu1 %v900_v33, %s3515_s27  ;;  %v1130_v33 = vld [vmem:[%s4825_s11 + $0x180] sm:$0xff] }
 0x3d2   :  { %v3473_v52 = vpop.eup %3472 }
 0x3d3   :  { %1011 = vrot.lane.b32.xlu0 %v1006_v36, %s3512_s25  ;;  %v932_v56 = vmul.f32 %v3473_v52, %v3930_v29  ;;  %v1114_v36 = vld [vmem:[%s4825_s11 + $0x100] sm:$0xff] }
 0x3d4   :  { %v3475_v60 = vpop.eup %3474 }
 0x3d5   :  { %v925_v0 = vmul.f32 %v3475_v60, %v3947_v38  ;;  %1046 = vrot.lane.b32.xlu1 %v1041_v55, %s3515_s27  ;;  %v934_v2 = vsel %vm933_vm15, %v3930_v29, %v932_v56  ;;  %v1134_v29 = vld [vmem:[%s4825_s11 + $0x1a0] sm:$0xff]  ;;  %vm2413_vm15 = vcmask 516352  }
 0x3d6   :  { %v4083_v6 = vsel %vm935_vm0, %v936_v62, %v934_v2  ;;  %2991 = vmatprep.subr.mxu0 %v1134_v29  ;;  %vm2419_vm0 = vcmask 778752  }
 0x3d7   :  { %v927_v7 = vsel %vm926_vm1, %v3947_v38, %v925_v0  ;;  %1009 = vrot.lane.b32.xlu0 %v1005_v1, %s3512_s25  ;;  %v1071_v9 = vmul.f32 %v3857_v53, %v4083_v6  ;;  %v1099_v38 = vld [vmem:[%s4825_s11 + $0x88] sm:$0xff]  ;;  %2992 = vmatpush3.msra.mxu0 %v1118_v14  ;;  %v1067_v11 = vmul.f32 %v3863_v58, %v4083_v6  ;;  %vm2555_vm1 = vcmask 392192  }
 0x3d8   :  { %v4100_v15 = vsel %vm928_vm2, %v929_v5, %v927_v7  ;;  %2959 = vmatprep.subr.mxu1 %v1099_v38  ;;  %2993 = vmatprep.subr.mxu0 %v1133_v18  ;;  %v1318_v18 = vld [vmem:[%s4827_s13 + $0x18] sm:$0xff]  ;;  %vm2640_vm2 = vcmask 195584  }
 0x3d9   :  { %v1070_v16 = vmul.f32 %v3853_v50, %v4100_v15  ;;  %1056 = vrot.lane.b32.xlu1 %v1052_v8, %s3515_s27  ;;  %1073 = vst.msk [vmem:[#allocation3 + $0x38] sm:$0xff] %vm465_vm4, %v1071_v9  ;;  %2960 = vmatpush3.msra.mxu1 %v1083_v19  ;;  %v1066_v5 = vmul.f32 %v3849_v48, %v4100_v15  ;;  %v1316_v19 = vld [vmem:[%s4827_s13 + $0x8] sm:$0xff] }
 0x3da   :  { %2994 = vmatpush3.msra.mxu0 %v1117_v20  ;;  %2961 = vmatprep.subr.mxu1 %v1098_v21  ;;  %v1315_v20 = vld [vmem:[%s4827_s13] sm:$0xff] }
 0x3db   :  { %1072 = vst.msk [vmem:[#allocation3 + $0x18] sm:$0xff] %vm465_vm4, %v1070_v16  ;;  %1044 = vrot.lane.b32.xlu0 %v1040_v17, %s3515_s27  ;;  %2995 = vmatprep.subr.mxu0 %v1132_v23 }
 0x3dc   :  { %2962 = vmatpush3.msra.mxu1 %v1082_v24  ;;  %2996 = vmatpush3.msra.mxu0 %v1116_v26 }
 0x3dd   :  { %1033 = vrot.lane.b32.xlu1 %v4035_v32, %s3515_s27  ;;  %2997 = vmatprep.subr.mxu0 %v1131_v30 }
 0x3de   :  { %2998 = vmatpush3.msra.mxu0 %v1115_v27  ;;  %3280 = vmatprep.subr.mxu1 %v1318_v18 }
 0x3df   :  { %1021 = vrot.lane.b32.xlu0 %v1017_v25, %s3512_s25  ;;  %2999 = vmatprep.subr.mxu0 %v1130_v33  ;;  %v2754_v25 = vld [vmem:[%s4826_s12] ss:$0 sm:$0xff] }
 0x3e0   :  { %3000 = vmatpush3.msra.mxu0 %v1114_v36  ;;  %v1081_v16 = vld [vmem:[#allocation3 + $0x38] sm:$0xff] }
 0x3e1   :  { %1305 = vperm.xlu1 %3459, %v292_v28  }
 0x3e2   :  { %v1077_v34 = vld [vmem:[#allocation3 + $0x18] sm:$0xff] }
 0x3e3   :  { %1292 = vmatprep.mubr.f32.mxu0 %v1077_v34  ;;  %1023 = vrot.lane.b32.xlu0 %v1018_v31, %s3512_s25 }
 0x3e7   :  { %1058 = vrot.lane.b32.xlu0 %v1053_v37, %s3515_s27 }
 0x3eb   :  { %1310 = vperm.xlu0 %3458, %v293_v22  }
 0x429   :  { %v945_v39 = vpop.permute.xlu0 %944 }
 0x42a   :  { %949 = vst.msk [vmem:[#allocation3 + $0x20] sm:$0xff] %vm486_vm6, %v945_v39 }
 0x42b   :  { %v943_v52 = vpop.permute.xlu1 %942 }
 0x42c   :  { %948 = vst.msk [vmem:[#allocation3] sm:$0xff] %vm486_vm6, %v943_v52 }
 0x42d   :  { %v989_v54 = vpop.permute.xlu0 %988 }
 0x42e   :  { %993 = vst.msk [vmem:[#allocation3 + $0x30] sm:$0xff] %vm486_vm6, %v989_v54 }
 0x42f   :  { %v967_v55 = vpop.permute.xlu1 %966 }
 0x430   :  { %971 = vst.msk [vmem:[#allocation3 + $0x28] sm:$0xff] %vm486_vm6, %v967_v55 }
 0x433   :  { %v965_v32 = vpop.permute.xlu1 %964 }
 0x434   :  { %970 = vst.msk [vmem:[#allocation3 + $0x8] sm:$0xff] %vm486_vm6, %v965_v32 }
 0x437   :  { %v987_v56 = vpop.permute.xlu1 %986 }
 0x438   :  { %992 = vst.msk [vmem:[#allocation3 + $0x10] sm:$0xff] %vm486_vm6, %v987_v56 }
 0x43f   :  { %v999_v57 = vpop.permute.xlu1 %998 }
 0x440   :  { %1004 = vst.msk [vmem:[#allocation3 + $0x20] sm:$0xff] %vm1002_vm5, %v999_v57 }
 0x441   :  { %v997_v59 = vpop.permute.xlu0 %996 }
 0x442   :  { %1003 = vst.msk [vmem:[#allocation3] sm:$0xff] %vm1002_vm5, %v997_v59  ;;  %v3480_v59 = vld [vmem:[%s4851_s22] sm:$0xff] }
 0x443   :  { %v1032_v60 = vpop.permute.xlu1 %1031 }
 0x444   :  { %1038 = vst.msk [vmem:[#allocation3] sm:$0xff] %vm1037_vm7, %v1032_v60  ;;  %v2755_v60 = vld [vmem:[%s4828_s14] ss:$0 sm:$0xff] }
 0x445   :  { %v1012_v62 = vpop.permute.xlu0 %1011 }
 0x446   :  { %1016 = vst.msk [vmem:[#allocation3 + $0x28] sm:$0xff] %vm1002_vm5, %v1012_v62 }
 0x447   :  { %v1047_v63 = vpop.permute.xlu1 %1046 }
 0x448   :  { %1051 = vst.msk [vmem:[#allocation3 + $0x28] sm:$0xff] %vm1037_vm7, %v1047_v63 }
 0x449   :  { %1065 = vst.msk [vmem:[#allocation3 + $0x28] sm:$0xff] %vm465_vm4, %v4083_v6  ;;  %v1010_v0 = vpop.permute.xlu0 %1009  ;;  %v1317_v6 = vld [vmem:[%s4827_s13 + $0x10] sm:$0xff] }
 0x44a   :  { %1015 = vst.msk [vmem:[#allocation3 + $0x8] sm:$0xff] %vm1002_vm5, %v1010_v0 }
 0x44b   :  { %v1057_v1 = vpop.permute.xlu1 %1056  ;;  %v1074_v8 = vld [vmem:[#allocation3] sm:$0xff] }
 0x44d   :  { %v1045_v2 = vpop.permute.xlu0 %1044 }
 0x44e   :  { %1050 = vst.msk [vmem:[#allocation3 + $0x8] sm:$0xff] %vm1037_vm7, %v1045_v2 }
 0x44f   :  { %1064 = vst.msk [vmem:[#allocation3 + $0x8] sm:$0xff] %vm465_vm4, %v4100_v15  ;;  %v1034_v3 = vpop.permute.xlu1 %1033 }
 0x450   :  { %1039 = vst.msk [vmem:[#allocation3 + $0x20] sm:$0xff] %vm1037_vm7, %v1034_v3  ;;  %v1079_v9 = vld [vmem:[#allocation3 + $0x28] sm:$0xff] }
 0x451   :  { %v1022_v4 = vpop.permute.xlu0 %1021 }
 0x452   :  { %1027 = vst.msk [vmem:[#allocation3 + $0x10] sm:$0xff] %vm1002_vm5, %v1022_v4 }
 0x453   :  { %1062 = vst.msk [vmem:[#allocation3 + $0x10] sm:$0xff] %vm1037_vm7, %v1057_v1 }
 0x454   :  { %1068 = vst.msk [vmem:[#allocation3 + $0x10] sm:$0xff] %vm465_vm4, %v1066_v5 }
 0x455   :  { %v1024_v29 = vpop.permute.xlu0 %1023 }
 0x456   :  { %1028 = vst.msk [vmem:[#allocation3 + $0x30] sm:$0xff] %vm1002_vm5, %v1024_v29  ;;  %v1075_v7 = vld [vmem:[#allocation3 + $0x8] sm:$0xff] }
 0x457   :  { %1217 = vmatprep.mubr.f32.mxu1 %v1075_v7  ;;  %v1078_v15 = vld [vmem:[#allocation3 + $0x20] sm:$0xff] }
 0x458   :  { %1218 = vmatmul.mubr.f32.vlgmr.msra.gmra.mxu1 %v1074_v8  ;;  %v3483_v8 = vld [vmem:[%s4851_s22 + $0x18] sm:$0xff] }
 0x459   :  { %1222 = vmatprep.mubr.f32.mxu1 %v1079_v9  ;;  %v1059_v14 = vpop.permute.xlu0 %1058  ;;  %3281 = vmatpush3.msra.mxu1 %v1318_v18  ;;  %v3484_v9 = vld [vmem:[%s4851_s22 + $0x20] sm:$0xff]  ;;  %v2777_v18 = vld [vmem:[%s4823_s9 + $0xd8] sm:$0xff] }
 0x45a   :  { %1063 = vst.msk [vmem:[#allocation3 + $0x30] sm:$0xff] %vm1037_vm7, %v1059_v14  ;;  %3282 = vmatprep.subr.mxu1 %v1317_v6  ;;  %v3486_v14 = vld [vmem:[%s4851_s22 + $0x30] sm:$0xff] }
 0x45b   :  { %1069 = vst.msk [vmem:[#allocation3 + $0x30] sm:$0xff] %vm465_vm4, %v1067_v11  ;;  %v1076_v38 = vld [vmem:[#allocation3 + $0x10] sm:$0xff]  ;;  %3283 = vmatpush3.msra.mxu1 %v1317_v6  ;;  %v3485_v11 = vld [vmem:[%s4851_s22 + $0x28] sm:$0xff] }
 0x45c   :  { %1223 = vmatmul.mubr.f32.gmra.mxu1 %v1078_v15  ;;  %1293 = vmatmul.mubr.f32.vlgmr.msra.gmra.mxu0 %v1076_v38  ;;  %v4205_v36 = vpop.permute.xlu1 %1305  ;;  %v3487_v15 = vld [vmem:[%s4851_s22 + $0x38] sm:$0xff]  ;;  %v2776_v6 = vld [vmem:[%s4823_s9 + $0xd0] sm:$0xff] }
 0x45d   :  { %1297 = vmatprep.mubr.f32.mxu0 %v1081_v16  ;;  %3284 = vmatprep.subr.mxu1 %v1316_v19  ;;  %v2781_v38 = vld [vmem:[%s4823_s9 + $0xf8] sm:$0xff]  ;;  %v2780_v16 = vld [vmem:[%s4823_s9 + $0xf0] sm:$0xff] }
 0x45e   :  { %3285 = vmatpush3.msra.mxu1 %v1316_v19  ;;  %3307 = vmatprep.subr.mxu0 %v2781_v38  ;;  %v2775_v19 = vld [vmem:[%s4823_s9 + $0xc8] sm:$0xff] }
 0x45f   :  { %3286 = vmatprep.subr.mxu1 %v1315_v20  ;;  %3308 = vmatpush3.msra.mxu0 %v2781_v38 }
 0x460   :  { %3287 = vmatpush3.msra.mxu1 %v1315_v20  ;;  %3309 = vmatprep.subr.mxu0 %v2780_v16  ;;  %v2774_v20 = vld [vmem:[%s4823_s9 + $0xc0] sm:$0xff] }
 0x461   :  { %3310 = vmatpush3.msra.mxu0 %v2780_v16 }
 0x462   :  { %v1080_v17 = vld [vmem:[#allocation3 + $0x30] sm:$0xff] }
 0x463   :  { %1298 = vmatmul.mubr.f32.gmra.mxu0 %v1080_v17  ;;  %v2779_v17 = vld [vmem:[%s4823_s9 + $0xe8] sm:$0xff] }
 0x464   :  { %3311 = vmatprep.subr.mxu0 %v2779_v17 }
 0x465   :  { %3312 = vmatpush3.msra.mxu0 %v2779_v17 }
 0x466   :  { %v4209_v56 = vpop.permute.xlu0 %1310 }
 0x518   :  { %v2963_v21 = vpop.f32.mrf.mxu1 }
 0x51a   :  { %v2964_v23 = vpop.f32.mrf.mxu1 }
 0x51b   :  { %v2965_v24 = vadd.f32 %v2964_v23, %v2963_v21  ;;  %v2773_v21 = vld [vmem:[%s4823_s9 + $0xb8] sm:$0xff]  ;;  %v2772_v23 = vld [vmem:[%s4823_s9 + $0xb0] sm:$0xff] }
 0x51c   :  { %v2966_v26 = vpop.f32.mrf.mxu1  ;;  %v3001_v28 = vpop.f32.mrf.mxu0 }
 0x51d   :  { %v1220_v27 = vadd.f32 %v2965_v24, %v2754_v25  ;;  %v2771_v24 = vld [vmem:[%s4823_s9 + $0xa8] sm:$0xff] }
 0x51e   :  { %v3002_v30 = vpop.f32.mrf.mxu0  ;;  %v2967_v31 = vpop.f32.mrf.mxu1 }
 0x51f   :  { %v3003_v33 = vadd.f32 %v3002_v30, %v3001_v28  ;;  %v2968_v37 = vadd.f32 %v2967_v31, %v2966_v26  ;;  %v2769_v26 = vld [vmem:[%s4823_s9 + $0x98] sm:$0xff]  ;;  %v2768_v30 = vld [vmem:[%s4823_s9 + $0x90] sm:$0xff]  ;;  %v2767_v31 = vld [vmem:[%s4823_s9 + $0x88] sm:$0xff] }
 0x521   :  { %v1295_v34 = vadd.f32 %v3003_v33, %v1220_v27  ;;  %v1225_v54 = vadd.f32 %v2968_v37, %v2754_v25  ;;  %v2770_v25 = vld [vmem:[%s4823_s9 + $0xa0] sm:$0xff] }
 0x522   :  { %v2766_v33 = vld [vmem:[%s4823_s9 + $0x80] sm:$0xff] }
 0x523   :  { %v1313_v22 = vmul.f32 %v4205_v36, %v1295_v34  ;;  %v3004_v39 = vpop.f32.mrf.mxu0 }
 0x525   :  { %v3005_v52 = vpop.f32.mrf.mxu0  ;;  %3288 = vmatprep.mubr.msk.f32.mxu1 %vm465_vm4, %v1313_v22 }
 0x526   :  { %v3006_v55 = vadd.f32 %v3005_v52, %v3004_v39 }
 0x528   :  { %v1300_v32 = vadd.f32 %v3006_v55, %v1225_v54 }
 0x52a   :  { %v1314_v57 = vmul.f32 %v4209_v56, %v1300_v32 }
 0x52c   :  { %3289 = vmatmul.mubr.msk.f32.vlgmr.msra.gmra.mxu1 %vm465_vm4, %v1314_v57 }
 0x52d   :  { %3295 = vmatprep.mubr.msk.f32.mxu1 %vm335_vm3, %v3480_v59 }
 0x5ec   :  { %v3290_v62 = vpop.f32.mrf.mxu1 }
 0x5ed   :  { %v1404_v63 = vadd.f32 %v3290_v62, %v2755_v60 }
 0x5ee   :  { %v1398_v0 = vpop.f32.mrf.mxu1 }
 0x5ef   :  { %vm1408_vm8 = vcmp.ge.f32.partialorder %v1404_v63, 0.0  ;;  %v1410_v1 = vmul.f32 0.01, %v1404_v63  ;;  %v1399_v2 = vadd.f32 %v2755_v60, %v1398_v0 }
 0x5f1   :  { %v1412_v3 = vsel %vm1408_vm8, %v1404_v63, %v1410_v1  ;;  %vm1407_vm9 = vcmp.ge.f32.partialorder %v1399_v2, 0.0  ;;  %v1409_v4 = vmul.f32 0.01, %v1399_v2 }
 0x5f2   :  { %v4221_v5 = vadd.f32 %v3675_v12, %v1412_v3  ;;  %v3481_v12 = vld [vmem:[%s4851_s22 + $0x8] sm:$0xff]  ;;  %v2783_v3 = vld [vmem:[%s4824_s10 + $0x1] ss:$0 sm:$0xff] }
 0x5f3   :  { %v1411_v29 = vsel %vm1407_vm9, %v1399_v2, %v1409_v4 }
 0x5f4   :  { %1944 = vst.msk [vmem:[#allocation3 + $0x20] sm:$0xff] %vm465_vm4, %v4221_v5  ;;  %v4226_v7 = vadd.f32 %v1411_v29, %v3680_v13  ;;  %3291 = vmatprep.subr.mxu1 %v4221_v5  ;;  %v3482_v13 = vld [vmem:[%s4851_s22 + $0x10] sm:$0xff] }
 0x5f5   :  { %3292 = vmatpush3.msra.mxu1 %v4221_v5 }
 0x5f6   :  { %1943 = vst.msk [vmem:[#allocation3] sm:$0xff] %vm465_vm4, %v4226_v7  ;;  %3293 = vmatprep.subr.mxu1 %v4226_v7 }
 0x5f7   :  { %3294 = vmatpush3.msra.mxu1 %v4226_v7 }
 0x5f8   :  { %3296 = vmatmul.mubr.msk.f32.vlgmr.msra.gmra.mxu1 %vm335_vm3, %v3481_v12 }
 0x5f9   :  { %3298 = vmatprep.mubr.msk.f32.mxu1 %vm335_vm3, %v3482_v13 }
 0x5fc   :  { %3299 = vmatmul.mubr.msk.f32.gmra.mxu1 %vm335_vm3, %v3483_v8 }
 0x5fd   :  { %3301 = vmatprep.mubr.msk.f32.mxu1 %vm335_vm3, %v3484_v9 }
 0x600   :  { %3302 = vmatmul.mubr.msk.f32.gmra.mxu1 %vm335_vm3, %v3485_v11 }
 0x601   :  { %3304 = vmatprep.mubr.msk.f32.mxu1 %vm335_vm3, %v3486_v14 }
 0x604   :  { %3305 = vmatmul.mubr.msk.f32.gmra.mxu1 %vm335_vm3, %v3487_v15  ;;  %v3488_v15 = vld [vmem:[%s4852_s4] sm:$0xff] }
 0x605   :  { %3353 = vmatprep.mubr.msk.f32.mxu1 %vm465_vm4, %v3789_v61  ;;  %v2778_v61 = vld [vmem:[%s4823_s9 + $0xe0] sm:$0xff] }
 0x606   :  { %3313 = vmatprep.subr.mxu0 %v2778_v61 }
 0x607   :  { %3314 = vmatpush3.msra.mxu0 %v2778_v61 }
 0x608   :  { %3315 = vmatprep.subr.mxu0 %v2777_v18 }
 0x609   :  { %3316 = vmatpush3.msra.mxu0 %v2777_v18  ;;  %v2823_v18 = vld [vmem:[%s4825_s11 + $0x2f8] sm:$0xff] }
 0x60a   :  { %3317 = vmatprep.subr.mxu0 %v2776_v6 }
 0x60b   :  { %3318 = vmatpush3.msra.mxu0 %v2776_v6  ;;  %v2806_v6 = vld [vmem:[%s4825_s11 + $0x270] sm:$0xff] }
 0x60c   :  { %3319 = vmatprep.subr.mxu0 %v2775_v19 }
 0x60d   :  { %3320 = vmatpush3.msra.mxu0 %v2775_v19  ;;  %v2855_v19 = vld [vmem:[%s4825_s11 + $0x3f8] sm:$0xff] }
 0x60e   :  { %3321 = vmatprep.subr.mxu0 %v2774_v20 }
 0x60f   :  { %3322 = vmatpush3.msra.mxu0 %v2774_v20  ;;  %v2821_v20 = vld [vmem:[%s4825_s11 + $0x2e8] sm:$0xff] }
 0x610   :  { %3323 = vmatprep.subr.mxu0 %v2773_v21 }
 0x611   :  { %3324 = vmatpush3.msra.mxu0 %v2773_v21  ;;  %v2839_v21 = vld [vmem:[%s4825_s11 + $0x378] sm:$0xff] }
 0x612   :  { %3325 = vmatprep.subr.mxu0 %v2772_v23 }
 0x613   :  { %3326 = vmatpush3.msra.mxu0 %v2772_v23 }
 0x614   :  { %3327 = vmatprep.subr.mxu0 %v2771_v24 }
 0x615   :  { %3328 = vmatpush3.msra.mxu0 %v2771_v24  ;;  %v2805_v24 = vld [vmem:[%s4825_s11 + $0x268] sm:$0xff] }
 0x616   :  { %3329 = vmatprep.subr.mxu0 %v2770_v25 }
 0x617   :  { %3330 = vmatpush3.msra.mxu0 %v2770_v25  ;;  %v2854_v25 = vld [vmem:[%s4825_s11 + $0x3f0] sm:$0xff] }
 0x618   :  { %3331 = vmatprep.subr.mxu0 %v2769_v26 }
 0x619   :  { %3332 = vmatpush3.msra.mxu0 %v2769_v26 }
 0x61a   :  { %3333 = vmatprep.subr.mxu0 %v2768_v30 }
 0x61b   :  { %3334 = vmatpush3.msra.mxu0 %v2768_v30  ;;  %v2838_v30 = vld [vmem:[%s4825_s11 + $0x370] sm:$0xff] }
 0x61c   :  { %3335 = vmatprep.subr.mxu0 %v2767_v31 }
 0x61d   :  { %3336 = vmatpush3.msra.mxu0 %v2767_v31 }
 0x61e   :  { %3337 = vmatprep.subr.mxu0 %v2766_v33 }
 0x61f   :  { %3338 = vmatpush3.msra.mxu0 %v2766_v33  ;;  %v2804_v33 = vld [vmem:[%s4825_s11 + $0x260] sm:$0xff] }
 0x620   :  { %3063 = vmatprep.subr.mxu0 %v2823_v18 }
 0x6b8   :  { %v3297_v28 = vpop.f32.mrf.mxu1 }
 0x6b9   :  { %1521 = vst.msk [vmem:[#allocation2 + $0x8] sm:$0xff] %vm465_vm4, %v3297_v28  ;;  %v2820_v28 = vld [vmem:[%s4825_s11 + $0x2e0] sm:$0xff] }
 0x6ba   :  { %v1481_v27 = vpop.f32.mrf.mxu1 }
 0x6bb   :  { %1520 = vst.msk [vmem:[#allocation2] sm:$0xff] %vm465_vm4, %v1481_v27 }
 0x6bc   :  { %v3300_v34 = vpop.f32.mrf.mxu1 }
 0x6bd   :  { %1523 = vst.msk [vmem:[#allocation2 + $0x18] sm:$0xff] %vm465_vm4, %v3300_v34 }
 0x6be   :  { %v1491_v37 = vpop.f32.mrf.mxu1 }
 0x6bf   :  { %1522 = vst.msk [vmem:[#allocation2 + $0x10] sm:$0xff] %vm465_vm4, %v1491_v37 }
 0x6c0   :  { %v3303_v22 = vpop.f32.mrf.mxu1 }
 0x6c1   :  { %1530 = vrot.lane.b32.xlu0 %v3303_v22, %s3513_s28 }
 0x6c2   :  { %v1501_v39 = vpop.f32.mrf.mxu1 }
 0x6c3   :  { %1528 = vrot.lane.b32.xlu1 %v1501_v39, %s3513_s28 }
 0x6c4   :  { %v3306_v52 = vpop.f32.mrf.mxu1 }
 0x6c5   :  { %1534 = vrot.lane.b32.xlu0 %v3306_v52, %s3513_s28 }
 0x6c6   :  { %v1511_v54 = vpop.f32.mrf.mxu1 }
 0x6c7   :  { %1532 = vrot.lane.b32.xlu1 %v1511_v54, %s3513_s28  ;;  %v2853_v54 = vld [vmem:[%s4825_s11 + $0x3e8] sm:$0xff] }
 0x733   :  { %v1531_v55 = vpop.permute.xlu0 %1530 }
 0x734   :  { %1541 = vst.msk [vmem:[#allocation2 + $0x8] sm:$0xff] %vm486_vm6, %v1531_v55  ;;  %v2803_v55 = vld [vmem:[%s4825_s11 + $0x258] sm:$0xff] }
 0x735   :  { %v1529_v32 = vpop.permute.xlu1 %1528 }
 0x736   :  { %1540 = vst.msk [vmem:[#allocation2] sm:$0xff] %vm486_vm6, %v1529_v32 }
 0x737   :  { %v1535_v57 = vpop.permute.xlu0 %1534 }
 0x738   :  { %1543 = vst.msk [vmem:[#allocation2 + $0x18] sm:$0xff] %vm486_vm6, %v1535_v57 }
 0x739   :  { %v1533_v59 = vpop.permute.xlu1 %1532 }
 0x73a   :  { %1542 = vst.msk [vmem:[#allocation2 + $0x10] sm:$0xff] %vm486_vm6, %v1533_v59  ;;  %v2818_v59 = vld [vmem:[%s4825_s11 + $0x2d0] sm:$0xff] }
 0x73b   :  { %v1545_v62 = vld [vmem:[#allocation2 + $0x8] sm:$0xff] }
 0x73d   :  { %v1544_v60 = vld [vmem:[#allocation2] sm:$0xff] }
 0x73e   :  { %3339 = vmatprep.mubr.f32.mxu0 %v1544_v60  ;;  %v2852_v60 = vld [vmem:[%s4825_s11 + $0x3e0] sm:$0xff] }
 0x73f   :  { %3340 = vmatmul.mubr.f32.vlgmr.msra.gmra.mxu0 %v1545_v62  ;;  %v1547_v0 = vld [vmem:[#allocation2 + $0x18] sm:$0xff]  ;;  %v2802_v62 = vld [vmem:[%s4825_s11 + $0x250] sm:$0xff] }
 0x741   :  { %v1546_v63 = vld [vmem:[#allocation2 + $0x10] sm:$0xff] }
 0x742   :  { %3342 = vmatprep.mubr.f32.mxu0 %v1546_v63 }
 0x743   :  { %3343 = vmatmul.mubr.f32.gmra.mxu0 %v1547_v0 }
 0x7ff   :  { %v3341_v1 = vpop.f32.mrf.mxu0 }
 0x800   :  { %v1645_v8 = vadd.f32 %v3341_v1, %v2783_v3 }
 0x801   :  { %v1639_v2 = vpop.f32.mrf.mxu0 }
 0x802   :  { %v1640_v9 = vadd.f32 %v2783_v3, %v1639_v2  ;;  %v1734_v38 = vmul.f32 %v1645_v8, %v1645_v8  ;;  %v2836_v2 = vld [vmem:[%s4825_s11 + $0x360] sm:$0xff] }
 0x803   :  { %v3344_v4 = vpop.f32.mrf.mxu0 }
 0x804   :  { %v1655_v29 = vadd.f32 %v3344_v4, %v2783_v3  ;;  %v1733_v16 = vmul.f32 %v1640_v9, %v1640_v9  ;;  %v2817_v4 = vld [vmem:[%s4825_s11 + $0x2c8] sm:$0xff] }
 0x805   :  { %v1649_v12 = vpop.f32.mrf.mxu0 }
 0x806   :  { %v1650_v13 = vadd.f32 %v2783_v3, %v1649_v12  ;;  %3345 = vmatprep.subr.mxu1 %v1655_v29  ;;  %v1736_v11 = vmul.f32 %v1655_v29, %v1655_v29  ;;  %v2801_v12 = vld [vmem:[%s4825_s11 + $0x248] sm:$0xff] }
 0x807   :  { %3346 = vmatpush3.msra.mxu1 %v1655_v29 }
 0x808   :  { %3347 = vmatprep.subr.mxu1 %v1650_v13  ;;  %v1735_v14 = vmul.f32 %v1650_v13, %v1650_v13 }
 0x809   :  { %3348 = vmatpush3.msra.mxu1 %v1650_v13 }
 0x80a   :  { %3349 = vmatprep.subr.mxu1 %v1645_v8 }
 0x80b   :  { %3350 = vmatpush3.msra.mxu1 %v1645_v8 }
 0x80c   :  { %3351 = vmatprep.subr.mxu1 %v1640_v9 }
 0x80d   :  { %3352 = vmatpush3.msra.mxu1 %v1640_v9 }
 0x80e   :  { %3354 = vmatmul.mubr.msk.f32.vlgmr.msra.gmra.mxu1 %vm465_vm4, %v3805_v35  ;;  %3356 = vmatprep.subr.mxu1 %v1736_v11 }
 0x80f   :  { %3357 = vmatpush3.msra.mxu1 %v1736_v11  ;;  %3364 = vmatprep.mubr.msk.f32.mxu1 %vm465_vm4, %v3488_v15  ;;  %v2816_v15 = vld [vmem:[%s4825_s11 + $0x2c0] sm:$0xff] }
 0x810   :  { %3358 = vmatprep.subr.mxu1 %v1735_v14 }
 0x811   :  { %3359 = vmatpush3.msra.mxu1 %v1735_v14  ;;  %v2835_v14 = vld [vmem:[%s4825_s11 + $0x358] sm:$0xff] }
 0x812   :  { %3360 = vmatprep.subr.mxu1 %v1734_v38 }
 0x813   :  { %3361 = vmatpush3.msra.mxu1 %v1734_v38 }
 0x814   :  { %3362 = vmatprep.subr.mxu1 %v1733_v16 }
 0x815   :  { %3363 = vmatpush3.msra.mxu1 %v1733_v16  ;;  %v2850_v16 = vld [vmem:[%s4825_s11 + $0x3d0] sm:$0xff] }
 0x816   :  { %3365 = vmatmul.mubr.msk.f32.vlgmr.msra.gmra.mxu1 %vm465_vm4, %v3805_v35  ;;  %3367 = vmatprep.subr.mxu1 %v1655_v29 }
 0x817   :  { %3368 = vmatpush3.msra.mxu1 %v1655_v29  ;;  %3375 = vmatprep.mubr.msk.f32.mxu1 %vm465_vm4, %v3814_v40  ;;  %v2851_v29 = vld [vmem:[%s4825_s11 + $0x3d8] sm:$0xff] }
 0x818   :  { %3369 = vmatprep.subr.mxu1 %v1650_v13 }
 0x819   :  { %3370 = vmatpush3.msra.mxu1 %v1650_v13 }
 0x81a   :  { %3371 = vmatprep.subr.mxu1 %v1645_v8 }
 0x81b   :  { %3372 = vmatpush3.msra.mxu1 %v1645_v8 }
 0x81c   :  { %3373 = vmatprep.subr.mxu1 %v1640_v9 }
 0x81d   :  { %3374 = vmatpush3.msra.mxu1 %v1640_v9 }
 0x81e   :  { %3376 = vmatmul.mubr.msk.f32.vlgmr.msra.gmra.mxu1 %vm465_vm4, %v3823_v41  ;;  %v2807_v41 = vld [vmem:[%s4825_s11 + $0x278] sm:$0xff]  ;;  %3101 = vmatprep.subr.mxu1 %v2855_v19 }
 0x81f   :  { %3378 = vmatprep.mubr.msk.f32.mxu1 %vm465_vm4, %v3828_v42  ;;  %v2822_v42 = vld [vmem:[%s4825_s11 + $0x2f0] sm:$0xff]  ;;  %3064 = vmatpush3.msra.mxu0 %v2807_v41 }
 0x820   :  { %3065 = vmatprep.subr.mxu0 %v2822_v42  ;;  %3102 = vmatpush3.msra.mxu1 %v2839_v21 }
 0x821   :  { %3066 = vmatpush3.msra.mxu0 %v2806_v6  ;;  %3103 = vmatprep.subr.mxu1 %v2854_v25  ;;  %v2799_v25 = vld [vmem:[%s4825_s11 + $0x238] sm:$0xff] }
 0x822   :  { %3379 = vmatmul.mubr.msk.f32.gmra.mxu1 %vm465_vm4, %v3837_v43  ;;  %3067 = vmatprep.subr.mxu0 %v2821_v20 }
 0x823   :  { %3068 = vmatpush3.msra.mxu0 %v2805_v24  ;;  %3104 = vmatpush3.msra.mxu1 %v2838_v30  ;;  %v2849_v24 = vld [vmem:[%s4825_s11 + $0x3c8] sm:$0xff]  ;;  %v2814_v30 = vld [vmem:[%s4825_s11 + $0x2b0] sm:$0xff] }
 0x824   :  { %3069 = vmatprep.subr.mxu0 %v2820_v28  ;;  %3105 = vmatprep.subr.mxu1 %v2853_v54  ;;  %v2833_v28 = vld [vmem:[%s4825_s11 + $0x348] sm:$0xff] }
 0x825   :  { %3070 = vmatpush3.msra.mxu0 %v2804_v33  ;;  %v2797_v54 = vld [vmem:[%s4825_s11 + $0x228] sm:$0xff] }
 0x8ce   :  { %v3355_v35 = vpop.f32.mrf.mxu1 }
 0x8cf   :  { %v1918_v17 = vmul.f32 %v3355_v35, %v3855_v51  ;;  %v2800_v35 = vld [vmem:[%s4825_s11 + $0x240] sm:$0xff] }
 0x8d0   :  { %v1724_v61 = vpop.f32.mrf.mxu1 }
 0x8d1   :  { %v1917_v40 = vmul.f32 %v1724_v61, %v3845_v46  ;;  %1949 = vrot.lane.b32.xlu0 %v1918_v17, %s3513_s28  ;;  %v1968_v43 = vmul.f32 %v1918_v17, %v3857_v53  ;;  %v1956_v23 = vmul.f32 %v1918_v17, %v3863_v58  ;;  %v1922_v31 = vmul.f32 %v1918_v17, %v1918_v17  ;;  %v2834_v17 = vld [vmem:[%s4825_s11 + $0x350] sm:$0xff] }
 0x8d3   :  { %1947 = vrot.lane.b32.xlu1 %v1917_v40, %s3513_s28  ;;  %v1921_v37 = vmul.f32 %v1917_v40, %v1917_v40  ;;  %v1955_v52 = vmul.f32 %v1917_v40, %v3849_v48  ;;  %v1967_v1 = vmul.f32 %v1917_v40, %v3853_v50 }
 0x8d5   :  { %1973 = vrot.lane.b32.xlu0 %v1968_v43, %s3513_s28 }
 0x8d6   :  { %v3366_v26 = vpop.f32.mrf.mxu1 }
 0x8d7   :  { %v1920_v27 = vmul.f32 %v3366_v26, %v3855_v51  ;;  %1961 = vrot.lane.b32.xlu1 %v1956_v23, %s3513_s28  ;;  %v2819_v51 = vld [vmem:[%s4825_s11 + $0x2d8] sm:$0xff] }
 0x8d8   :  { %v1803_v34 = vpop.f32.mrf.mxu1  ;;  %3071 = vmatprep.subr.mxu0 %v2819_v51  ;;  %v2815_v23 = vld [vmem:[%s4825_s11 + $0x2b8] sm:$0xff] }
 0x8d9   :  { %v1924_v22 = vsub.f32 %v1920_v27, %v1922_v31  ;;  %v1919_v39 = vmul.f32 %v1803_v34, %v3845_v46  ;;  %v2837_v46 = vld [vmem:[%s4825_s11 + $0x368] sm:$0xff]  ;;  %3072 = vmatpush3.msra.mxu0 %v2803_v55  ;;  %v2847_v51 = vld [vmem:[%s4825_s11 + $0x3b8] sm:$0xff] }
 0x8da   :  { %3106 = vmatpush3.msra.mxu1 %v2837_v46  ;;  %3073 = vmatprep.subr.mxu0 %v2818_v59  ;;  %v2831_v55 = vld [vmem:[%s4825_s11 + $0x338] sm:$0xff]  ;;  %v2812_v46 = vld [vmem:[%s4825_s11 + $0x2a0] sm:$0xff] }
 0x8db   :  { %v1926_v32 = vmax.f32 %v1924_v22, 0.0  ;;  %v1923_v57 = vsub.f32 %v1919_v39, %v1921_v37  ;;  %1959 = vrot.lane.b32.xlu1 %v1955_v52, %s3513_s28  ;;  %3107 = vmatprep.subr.mxu1 %v2852_v60  ;;  %v2798_v37 = vld [vmem:[%s4825_s11 + $0x230] sm:$0xff]  ;;  %v2832_v22 = vld [vmem:[%s4825_s11 + $0x340] sm:$0xff]  ;;  %v2813_v39 = vld [vmem:[%s4825_s11 + $0x2a8] sm:$0xff] }
 0x8dc   :  { %3074 = vmatpush3.msra.mxu0 %v2802_v62  ;;  %3108 = vmatpush3.msra.mxu1 %v2836_v2  ;;  %v2830_v62 = vld [vmem:[%s4825_s11 + $0x330] sm:$0xff]  ;;  %v2811_v2 = vld [vmem:[%s4825_s11 + $0x298] sm:$0xff] }
 0x8dd   :  { %v4412_v63 = vadd.f32 1e-05, %v1926_v32  ;;  %v1925_v0 = vmax.f32 %v1923_v57, 0.0  ;;  %3075 = vmatprep.subr.mxu0 %v2817_v4  ;;  %3109 = vmatprep.subr.mxu1 %v2851_v29 }
 0x8de   :  { %v3377_v3 = vpop.f32.mrf.mxu1  ;;  %3076 = vmatpush3.msra.mxu0 %v2801_v12  ;;  %3110 = vmatpush3.msra.mxu1 %v2835_v14  ;;  %v2795_v12 = vld [vmem:[%s4825_s11 + $0x218] sm:$0xff]  ;;  %v2829_v14 = vld [vmem:[%s4825_s11 + $0x328] sm:$0xff] }
 0x8df   :  { %3476 = vrsqrt.f32 %v4412_v63  ;;  %v4428_v13 = vadd.f32 1e-05, %v1925_v0  ;;  %v1898_v8 = vsel %vm869_vm11, %v3377_v3, -1e+30  ;;  %v1902_v9 = vsel %vm869_vm11, %v3377_v3, 1e+30  ;;  %1971 = vrot.lane.b32.xlu1 %v1967_v1, %s3513_s28  ;;  %3077 = vmatprep.subr.mxu0 %v2816_v15 }
 0x8e0   :  { %v1878_v11 = vpop.f32.mrf.mxu1  ;;  %v1900_v38 = vmax.f32 %v1898_v8, -1e+30  ;;  %v1904_v61 = vmin.f32 %v1902_v9, 1e+30  ;;  %3111 = vmatprep.subr.mxu1 %v2850_v16  ;;  %3078 = vmatpush3.msra.mxu0 %v2800_v35  ;;  %v2845_v3 = vld [vmem:[%s4825_s11 + $0x3a8] sm:$0xff]  ;;  %vm1938_vm3 = vcmp.eq.f32.partialorder %v4412_v63, inf }
 0x8e1   :  { %3478 = vrsqrt.f32 %v4428_v13  ;;  %v1897_v40 = vsel %vm868_vm12, %v1878_v11, -1e+30  ;;  %v1901_v18 = vsel %vm868_vm12, %v1878_v11, 1e+30  ;;  %3112 = vmatpush3.msra.mxu1 %v2834_v17  ;;  %3079 = vmatprep.subr.mxu0 %v2815_v23  ;;  %v1941_v29 = vand.u32 2147483648, %v4412_v63  ;;  %v2810_v15 = vld [vmem:[%s4825_s11 + $0x290] sm:$0xff] }
 0x8e2   :  { %v3380_v41 = vpop.f32.mrf.mxu1  ;;  %v1899_v42 = vmax.f32 %v1897_v40, -1e+30  ;;  %v1903_v43 = vmin.f32 %v1901_v18, 1e+30  ;;  %3113 = vmatprep.subr.mxu1 %v2849_v24  ;;  %3080 = vmatpush3.msra.mxu0 %v2799_v25  ;;  %vm1940_vm10 = vcmp.eq.f32.partialorder %v4412_v63, 0.0  ;;  %v2794_v40 = vld [vmem:[%s4825_s11 + $0x210] sm:$0xff] }
 0x8e3   :  { %v1906_v6 = vsel %vm889_vm13, %v3380_v41, -1e+30  ;;  %v1910_v20 = vsel %vm889_vm13, %v3380_v41, 1e+30  ;;  %3114 = vmatpush3.msra.mxu1 %v2833_v28  ;;  %3081 = vmatprep.subr.mxu0 %v2814_v30  ;;  %v2828_v18 = vld [vmem:[%s4825_s11 + $0x320] sm:$0xff]  ;;  %v2842_v23 = vld [vmem:[%s4825_s11 + $0x390] sm:$0xff] }
 0x8e4   :  { %v1908_v19 = vmax.f32 %v1900_v38, %v1906_v6  ;;  %v1888_v21 = vpop.f32.mrf.mxu1  ;;  %v1912_v27 = vmin.f32 %v1904_v61, %v1910_v20  ;;  %3115 = vmatprep.subr.mxu1 %v2848_v45  ;;  %3082 = vmatpush3.msra.mxu0 %v2798_v37  ;;  %v1934_v38 = vand.u32 2147483648, %v4428_v13  ;;  %v2843_v6 = vld [vmem:[%s4825_s11 + $0x398] sm:$0xff]  ;;  %v2792_v24 = vld [vmem:[%s4825_s11 + $0x200] sm:$0xff]  ;;  %v2825_v28 = vld [vmem:[%s4825_s11 + $0x308] sm:$0xff] }
 0x8e5   :  { %v1905_v26 = vsel %vm888_vm14, %v1888_v21, -1e+30  ;;  %v1909_v49 = vsel %vm888_vm14, %v1888_v21, 1e+30  ;;  %3116 = vmatpush3.msra.mxu1 %v2832_v22  ;;  %3083 = vmatprep.subr.mxu0 %v2813_v39  ;;  %v2827_v20 = vld [vmem:[%s4825_s11 + $0x318] sm:$0xff]  ;;  %v2808_v21 = vld [vmem:[%s4825_s11 + $0x280] sm:$0xff] }
 0x8e6   :  { %v1907_v31 = vmax.f32 %v1899_v42, %v1905_v26  ;;  %v1911_v33 = vmin.f32 %v1903_v43, %v1909_v49  ;;  %v4480_v34 = vsel %vm869_vm11, %v1908_v19, 0.0  ;;  %v4513_v32 = vsel %vm869_vm11, %v1912_v27, 0.0  ;;  %3117 = vmatprep.subr.mxu1 %v2847_v51  ;;  %3084 = vmatpush3.msra.mxu0 %v2797_v54  ;;  %v2793_v19 = vld [vmem:[%s4825_s11 + $0x208] sm:$0xff]  ;;  %v2826_v26 = vld [vmem:[%s4825_s11 + $0x310] sm:$0xff]  ;;  %v2840_v30 = vld [vmem:[%s4825_s11 + $0x380] sm:$0xff] }
 0x8e7   :  { %1983 = vrot.lane.b32.xlu1 %v4480_v34, %s3512_s25  ;;  %v1990_v59 = vmul.f32 %v4480_v34, %v3863_v58  ;;  %3118 = vmatpush3.msra.mxu1 %v2831_v55  ;;  %v2024_v0 = vmul.f32 %v4513_v32, %v3863_v58  ;;  %vm1931_vm11 = vcmp.eq.f32.partialorder %v4428_v13, inf  ;;  %v2841_v49 = vld [vmem:[%s4825_s11 + $0x388] sm:$0xff]  ;;  %vm2406_vm14 = vcmask 253952  }
 0x8e8   :  { %v4498_v52 = vsel %vm868_vm12, %v1907_v31, 0.0  ;;  %v1915_v57 = vsel %vm868_vm12, %v1911_v33, 0.0  ;;  %3085 = vmatprep.subr.mxu0 %v2812_v46  ;;  %3119 = vmatprep.subr.mxu1 %v2846_v47  ;;  %vm1933_vm12 = vcmp.eq.f32.partialorder %v4428_v13, 0.0  ;;  %v2824_v31 = vld [vmem:[%s4825_s11 + $0x300] sm:$0xff]  ;;  %v2036_v33 = vmul.f32 %v4513_v32, %v3857_v53 }
 0x8e9   :  { %1981 = vrot.lane.b32.xlu0 %v4498_v52, %s3512_s25  ;;  %3086 = vmatpush3.msra.mxu0 %v2796_v44  ;;  %v1989_v9 = vmul.f32 %v4498_v52, %v3849_v48  ;;  %v2035_v17 = vmul.f32 %v1915_v57, %v3853_v50  ;;  %v2023_v43 = vmul.f32 %v1915_v57, %v3849_v48 }
 0x8ea   :  { %3120 = vmatpush3.msra.mxu1 %v2830_v62  ;;  %3087 = vmatprep.subr.mxu0 %v2811_v2  ;;  %v2001_v25 = vmul.f32 %v4498_v52, %v3853_v50 }
 0x8eb   :  { %2015 = vrot.lane.b32.xlu1 %v1915_v57, %s3515_s27  ;;  %3121 = vmatprep.subr.mxu1 %v2845_v3 }
 0x8ec   :  { %v3477_v60 = vpop.eup %3476  ;;  %3088 = vmatpush3.msra.mxu0 %v2795_v12  ;;  %3122 = vmatpush3.msra.mxu1 %v2829_v14  ;;  %v2858_v14 = vld [vmem:[%s4827_s13 + $0x20] sm:$0xff] }
 0x8ed   :  { %1995 = vrot.lane.b32.xlu0 %v1990_v59, %s3512_s25  ;;  %v1937_v1 = vmul.f32 %v3477_v60, %v4412_v63  ;;  %3089 = vmatprep.subr.mxu0 %v2810_v15 }
 0x8ee   :  { %v3479_v4 = vpop.eup %3478  ;;  %3090 = vmatpush3.msra.mxu0 %v2794_v40 }
 0x8ef   :  { %v1930_v8 = vmul.f32 %v3479_v4, %v4428_v13  ;;  %2029 = vrot.lane.b32.xlu1 %v2024_v0, %s3515_s27  ;;  %v1939_v11 = vsel %vm1938_vm3, %v4412_v63, %v1937_v1  ;;  %v2844_v63 = vld [vmem:[%s4825_s11 + $0x3a0] sm:$0xff] }
 0x8f0   :  { %v4561_v16 = vsel %vm1940_vm10, %v1941_v29, %v1939_v11  ;;  %3123 = vmatprep.subr.mxu1 %v2844_v63  ;;  %v2859_v11 = vld [vmem:[%s4827_s13 + $0x28] sm:$0xff]  ;;  %v2857_v63 = vld [vmem:[%s4826_s12 + $0x1] ss:$0 sm:$0xff] }
 0x8f1   :  { %v1932_v35 = vsel %vm1931_vm11, %v4428_v13, %v1930_v8  ;;  %1993 = vrot.lane.b32.xlu0 %v1989_v9, %s3512_s25  ;;  %v2054_v61 = vmul.f32 %v4561_v16, %v3857_v53  ;;  %v2809_v13 = vld [vmem:[%s4825_s11 + $0x288] sm:$0xff]  ;;  %3124 = vmatpush3.msra.mxu1 %v2828_v18  ;;  %v2050_v3 = vmul.f32 %v4561_v16, %v3863_v58  ;;  %v2861_v9 = vld [vmem:[%s4827_s13 + $0x38] sm:$0xff]  ;;  %v2860_v58 = vld [vmem:[%s4827_s13 + $0x30] sm:$0xff] }
 0x8f2   :  { %v4578_v41 = vsel %vm1933_vm12, %v1934_v38, %v1932_v35  ;;  %3091 = vmatprep.subr.mxu0 %v2809_v13  ;;  %3125 = vmatprep.subr.mxu1 %v2843_v6 }
 0x8f3   :  { %v2053_v42 = vmul.f32 %v4578_v41, %v3853_v50  ;;  %2039 = vrot.lane.b32.xlu1 %v2035_v17, %s3515_s27  ;;  %2056 = vst.msk [vmem:[#allocation3 + $0x38] sm:$0xff] %vm465_vm4, %v2054_v61  ;;  %3092 = vmatpush3.msra.mxu0 %v2793_v19  ;;  %v2002_v50 = vmul.f32 %v4480_v34, %v3857_v53 }
 0x8f4   :  { %3126 = vmatpush3.msra.mxu1 %v2827_v20  ;;  %3093 = vmatprep.subr.mxu0 %v2808_v21  ;;  %v2049_v60 = vmul.f32 %v4578_v41, %v3849_v48 }
 0x8f5   :  { %2055 = vst.msk [vmem:[#allocation3 + $0x18] sm:$0xff] %vm465_vm4, %v2053_v42  ;;  %2027 = vrot.lane.b32.xlu0 %v2023_v43, %s3515_s27  ;;  %3127 = vmatprep.subr.mxu1 %v2842_v23 }
 0x8f6   :  { %3094 = vmatpush3.msra.mxu0 %v2792_v24  ;;  %3128 = vmatpush3.msra.mxu1 %v2826_v26  ;;  %v2462_v26 = vld [vmem:[%s4829_s15 + $0x70] sm:$0xff] }
 0x8f7   :  { %2017 = vrot.lane.b32.xlu1 %v4513_v32, %s3515_s27  ;;  %3129 = vmatprep.subr.mxu1 %v2841_v49  ;;  %v2459_v49 = vld [vmem:[%s4829_s15 + $0x58] sm:$0xff] }
 0x8f8   :  { %3130 = vmatpush3.msra.mxu1 %v2825_v28  ;;  %3381 = vmatprep.subr.mxu0 %v2861_v9  ;;  %v2458_v28 = vld [vmem:[%s4829_s15 + $0x50] sm:$0xff] }
 0x8f9   :  { %2005 = vrot.lane.b32.xlu0 %v2001_v25, %s3512_s25  ;;  %3131 = vmatprep.subr.mxu1 %v2840_v30  ;;  %v2463_v25 = vld [vmem:[%s4829_s15 + $0x78] sm:$0xff]  ;;  %v2456_v30 = vld [vmem:[%s4829_s15 + $0x40] sm:$0xff] }
 0x8fa   :  { %3132 = vmatpush3.msra.mxu1 %v2824_v31  ;;  %v2064_v12 = vld [vmem:[#allocation3 + $0x38] sm:$0xff]  ;;  %v2863_v31 = vld [vmem:[%s4828_s14 + $0x1] ss:$0 sm:$0xff] }
 0x8fb   :  { %3392 = vmatprep.subr.mxu1 %v3511_v10 }
 0x8fc   :  { %v2060_v27 = vld [vmem:[#allocation3 + $0x18] sm:$0xff] }
 0x8fd   :  { %2277 = vmatprep.mubr.f32.mxu1 %v2060_v27  ;;  %2007 = vrot.lane.b32.xlu0 %v2002_v50, %s3512_s25  ;;  %v2457_v50 = vld [vmem:[%s4829_s15 + $0x48] sm:$0xff]  ;;  %v2455_v27 = vld [vmem:[%s4829_s15 + $0x38] sm:$0xff] }
 0x901   :  { %2041 = vrot.lane.b32.xlu0 %v2036_v33, %s3515_s27 }
 0x943   :  { %v1950_v34 = vpop.permute.xlu0 %1949 }
 0x944   :  { %1954 = vst.msk [vmem:[#allocation3 + $0x20] sm:$0xff] %vm486_vm6, %v1950_v34 }
 0x945   :  { %v1948_v45 = vpop.permute.xlu1 %1947 }
 0x946   :  { %1953 = vst.msk [vmem:[#allocation3] sm:$0xff] %vm486_vm6, %v1948_v45 }
 0x947   :  { %v1974_v37 = vpop.permute.xlu0 %1973 }
 0x948   :  { %1978 = vst.msk [vmem:[#allocation3 + $0x30] sm:$0xff] %vm486_vm6, %v1974_v37 }
 0x949   :  { %v1962_v22 = vpop.permute.xlu1 %1961 }
 0x94a   :  { %1966 = vst.msk [vmem:[#allocation3 + $0x28] sm:$0xff] %vm486_vm6, %v1962_v22 }
 0x94d   :  { %v1960_v39 = vpop.permute.xlu1 %1959 }
 0x94e   :  { %1965 = vst.msk [vmem:[#allocation3 + $0x8] sm:$0xff] %vm486_vm6, %v1960_v39 }
 0x951   :  { %v1972_v53 = vpop.permute.xlu1 %1971 }
 0x952   :  { %1977 = vst.msk [vmem:[#allocation3 + $0x10] sm:$0xff] %vm486_vm6, %v1972_v53 }
 0x959   :  { %v1984_v52 = vpop.permute.xlu1 %1983 }
 0x95a   :  { %1988 = vst.msk [vmem:[#allocation3 + $0x20] sm:$0xff] %vm1002_vm5, %v1984_v52 }
 0x95b   :  { %v1982_v51 = vpop.permute.xlu0 %1981 }
 0x95c   :  { %1987 = vst.msk [vmem:[#allocation3] sm:$0xff] %vm1002_vm5, %v1982_v51 }
 0x95d   :  { %v2016_v54 = vpop.permute.xlu1 %2015 }
 0x95e   :  { %2021 = vst.msk [vmem:[#allocation3] sm:$0xff] %vm1037_vm7, %v2016_v54 }
 0x95f   :  { %v1996_v55 = vpop.permute.xlu0 %1995 }
 0x960   :  { %2000 = vst.msk [vmem:[#allocation3 + $0x28] sm:$0xff] %vm1002_vm5, %v1996_v55 }
 0x961   :  { %v2030_v32 = vpop.permute.xlu1 %2029 }
 0x962   :  { %2034 = vst.msk [vmem:[#allocation3 + $0x28] sm:$0xff] %vm1037_vm7, %v2030_v32 }
 0x963   :  { %2048 = vst.msk [vmem:[#allocation3 + $0x28] sm:$0xff] %vm465_vm4, %v4561_v16  ;;  %v1994_v57 = vpop.permute.xlu0 %1993 }
 0x964   :  { %1999 = vst.msk [vmem:[#allocation3 + $0x8] sm:$0xff] %vm1002_vm5, %v1994_v57 }
 0x965   :  { %v2040_v46 = vpop.permute.xlu1 %2039  ;;  %v2057_v1 = vld [vmem:[#allocation3] sm:$0xff] }
 0x967   :  { %v2028_v59 = vpop.permute.xlu0 %2027 }
 0x968   :  { %2033 = vst.msk [vmem:[#allocation3 + $0x8] sm:$0xff] %vm1037_vm7, %v2028_v59 }
 0x969   :  { %2047 = vst.msk [vmem:[#allocation3 + $0x8] sm:$0xff] %vm465_vm4, %v4578_v41  ;;  %v2018_v47 = vpop.permute.xlu1 %2017 }
 0x96a   :  { %2022 = vst.msk [vmem:[#allocation3 + $0x20] sm:$0xff] %vm1037_vm7, %v2018_v47  ;;  %v2062_v2 = vld [vmem:[#allocation3 + $0x28] sm:$0xff] }
 0x96b   :  { %v2006_v44 = vpop.permute.xlu0 %2005 }
 0x96c   :  { %2011 = vst.msk [vmem:[#allocation3 + $0x10] sm:$0xff] %vm1002_vm5, %v2006_v44  ;;  %v2454_v44 = vld [vmem:[%s4829_s15 + $0x30] sm:$0xff] }
 0x96d   :  { %2045 = vst.msk [vmem:[#allocation3 + $0x10] sm:$0xff] %vm1037_vm7, %v2040_v46 }
 0x96e   :  { %2051 = vst.msk [vmem:[#allocation3 + $0x10] sm:$0xff] %vm465_vm4, %v2049_v60 }
 0x96f   :  { %v2008_v62 = vpop.permute.xlu0 %2007 }
 0x970   :  { %2012 = vst.msk [vmem:[#allocation3 + $0x30] sm:$0xff] %vm1002_vm5, %v2008_v62  ;;  %v2058_v0 = vld [vmem:[#allocation3 + $0x8] sm:$0xff]  ;;  %vm2714_vm5 = vcmask 25600  }
 0x971   :  { %2202 = vmatprep.mubr.f32.mxu0 %v2058_v0  ;;  %v2061_v48 = vld [vmem:[#allocation3 + $0x20] sm:$0xff] }
 0x972   :  { %2203 = vmatmul.mubr.f32.vlgmr.msra.gmra.mxu0 %v2057_v1 }
 0x973   :  { %2207 = vmatprep.mubr.f32.mxu0 %v2062_v2  ;;  %v2042_v4 = vpop.permute.xlu0 %2041  ;;  %3382 = vmatpush3.msra.mxu0 %v2861_v9  ;;  %v2451_v9 = vld [vmem:[%s4829_s15 + $0x18] sm:$0xff] }
 0x974   :  { %2046 = vst.msk [vmem:[#allocation3 + $0x30] sm:$0xff] %vm1037_vm7, %v2042_v4  ;;  %3383 = vmatprep.subr.mxu0 %v2860_v58 }
 0x975   :  { %2052 = vst.msk [vmem:[#allocation3 + $0x30] sm:$0xff] %vm465_vm4, %v2050_v3  ;;  %v2059_v29 = vld [vmem:[#allocation3 + $0x10] sm:$0xff]  ;;  %3384 = vmatpush3.msra.mxu0 %v2860_v58 }
 0x976   :  { %2208 = vmatmul.mubr.f32.gmra.mxu0 %v2061_v48  ;;  %2278 = vmatmul.mubr.f32.vlgmr.msra.gmra.mxu1 %v2059_v29  ;;  %v2452_v48 = vld [vmem:[%s4829_s15 + $0x20] sm:$0xff]  ;;  %v2450_v58 = vld [vmem:[%s4829_s15 + $0x10] sm:$0xff] }
 0x977   :  { %2282 = vmatprep.mubr.f32.mxu1 %v2064_v12  ;;  %3385 = vmatprep.subr.mxu0 %v2859_v11 }
 0x978   :  { %3386 = vmatpush3.msra.mxu0 %v2859_v11  ;;  %3393 = vmatpush3.msra.mxu1 %v2463_v25 }
 0x979   :  { %3387 = vmatprep.subr.mxu0 %v2858_v14  ;;  %3394 = vmatprep.subr.mxu1 %v3511_v10 }
 0x97a   :  { %3388 = vmatpush3.msra.mxu0 %v2858_v14  ;;  %3395 = vmatpush3.msra.mxu1 %v2462_v26 }
 0x97b   :  { %3427 = vmatprep.subr.mxu0 %v3511_v10  ;;  %3396 = vmatprep.subr.mxu1 %v3511_v10 }
 0x97c   :  { %v2063_v8 = vld [vmem:[#allocation3 + $0x30] sm:$0xff] }
 0x97d   :  { %2283 = vmatmul.mubr.f32.gmra.mxu1 %v2063_v8 }
 0xa32   :  { %v3095_v15 = vpop.f32.mrf.mxu0 }
 0xa34   :  { %v3096_v38 = vpop.f32.mrf.mxu0 }
 0xa35   :  { %v3097_v16 = vadd.f32 %v3096_v38, %v3095_v15  ;;  %v2449_v38 = vld [vmem:[%s4829_s15 + $0x8] sm:$0xff] }
 0xa36   :  { %v3098_v35 = vpop.f32.mrf.mxu0  ;;  %v3133_v17 = vpop.f32.mrf.mxu1 }
 0xa37   :  { %v2205_v40 = vadd.f32 %v3097_v16, %v2857_v63 }
 0xa38   :  { %v3134_v61 = vpop.f32.mrf.mxu1  ;;  %v3099_v18 = vpop.f32.mrf.mxu0 }
 0xa39   :  { %v3135_v41 = vadd.f32 %v3134_v61, %v3133_v17  ;;  %v3100_v42 = vadd.f32 %v3099_v18, %v3098_v35  ;;  %v2448_v17 = vld [vmem:[%s4829_s15] sm:$0xff] }
 0xa3b   :  { %v2280_v13 = vadd.f32 %v3135_v41, %v2205_v40  ;;  %v2210_v20 = vadd.f32 %v3100_v42, %v2857_v63  ;;  %v2547_v42 = vld [vmem:[%s4831_s17 + $0x28] sm:$0xff] }
 0xa3d   :  { %v2288_v43 = vmul.f32 %v2280_v13, %v4205_v36  ;;  %v3136_v6 = vpop.f32.mrf.mxu1  ;;  %v2461_v36 = vld [vmem:[%s4829_s15 + $0x68] sm:$0xff] }
 0xa3e   :  { %3397 = vmatpush3.msra.mxu1 %v2461_v36  ;;  %v2544_v36 = vld [vmem:[%s4831_s17 + $0x10] sm:$0xff] }
 0xa3f   :  { %v3137_v19 = vpop.f32.mrf.mxu1  ;;  %3389 = vmatprep.mubr.msk.f32.mxu0 %vm465_vm4, %v2288_v43  ;;  %3398 = vmatprep.subr.mxu1 %v3511_v10  ;;  %v2546_v43 = vld [vmem:[%s4831_s17 + $0x20] sm:$0xff] }
 0xa40   :  { %v3138_v21 = vadd.f32 %v3137_v19, %v3136_v6  ;;  %v2545_v19 = vld [vmem:[%s4831_s17 + $0x18] sm:$0xff] }
 0xa42   :  { %v2285_v23 = vadd.f32 %v3138_v21, %v2210_v20 }
 0xa44   :  { %v2289_v24 = vmul.f32 %v2285_v23, %v4209_v56  ;;  %v2460_v56 = vld [vmem:[%s4829_s15 + $0x60] sm:$0xff] }
 0xa45   :  { %3399 = vmatpush3.msra.mxu1 %v2460_v56  ;;  %v2543_v56 = vld [vmem:[%s4831_s17 + $0x8] sm:$0xff] }
 0xa46   :  { %3390 = vmatmul.mubr.msk.f32.vlgmr.msra.gmra.mxu0 %vm465_vm4, %v2289_v24  ;;  %3400 = vmatprep.subr.mxu1 %v3511_v10 }
 0xa47   :  { %3401 = vmatpush3.msra.mxu1 %v2459_v49  ;;  %3428 = vmatpush3.msra.mxu0 %v2547_v42  ;;  %v2542_v49 = vld [vmem:[%s4831_s17] sm:$0xff] }
 0xa48   :  { %3402 = vmatprep.subr.mxu1 %v3511_v10  ;;  %3429 = vmatprep.subr.mxu0 %v3511_v10 }
 0xa49   :  { %3403 = vmatpush3.msra.mxu1 %v2458_v28  ;;  %3430 = vmatpush3.msra.mxu0 %v2546_v43  ;;  %v2866_v28 = vld [vmem:[%s4830_s16] ss:$0 sm:$0xff] }
 0xa4a   :  { %3404 = vmatprep.subr.mxu1 %v3511_v10  ;;  %3431 = vmatprep.subr.mxu0 %v3511_v10 }
 0xa4b   :  { %3405 = vmatpush3.msra.mxu1 %v2457_v50  ;;  %3432 = vmatpush3.msra.mxu0 %v2545_v19 }
 0xa4c   :  { %3406 = vmatprep.subr.mxu1 %v3511_v10  ;;  %3433 = vmatprep.subr.mxu0 %v3511_v10 }
 0xa4d   :  { %3407 = vmatpush3.msra.mxu1 %v2456_v30  ;;  %3434 = vmatpush3.msra.mxu0 %v2544_v36 }
 0xa4e   :  { %3408 = vmatprep.subr.mxu1 %v3511_v10  ;;  %3435 = vmatprep.subr.mxu0 %v3511_v10 }
 0xa4f   :  { %3409 = vmatpush3.msra.mxu1 %v2455_v27  ;;  %3436 = vmatpush3.msra.mxu0 %v2543_v56 }
 0xa50   :  { %3410 = vmatprep.subr.mxu1 %v3511_v10  ;;  %3437 = vmatprep.subr.mxu0 %v3511_v10 }
 0xa51   :  { %3411 = vmatpush3.msra.mxu1 %v2454_v44  ;;  %3438 = vmatpush3.msra.mxu0 %v2542_v49 }
 0xa52   :  { %3412 = vmatprep.subr.mxu1 %v3511_v10  ;;  %3442 = vmatprep.subr.mxu0 %v3511_v10 }
 0xb06   :  { %v3391_v33 = vpop.f32.mrf.mxu0 }
 0xb07   :  { %v2381_v34 = vadd.f32 %v3391_v33, %v2863_v31  ;;  %v2632_v33 = vld [vmem:[%s4833_s19 + $0x10] sm:$0xff] }
 0xb08   :  { %v2375_v45 = vpop.f32.mrf.mxu0 }
 0xb09   :  { %vm2385_vm6 = vcmp.ge.f32.partialorder %v2381_v34, 0.0  ;;  %v2387_v37 = vmul.f32 0.01, %v2381_v34  ;;  %v2376_v22 = vadd.f32 %v2863_v31, %v2375_v45  ;;  %v2630_v45 = vld [vmem:[%s4833_s19] sm:$0xff] }
 0xb0b   :  { %v2389_v39 = vsel %vm2385_vm6, %v2381_v34, %v2387_v37  ;;  %vm2384_vm13 = vcmp.ge.f32.partialorder %v2376_v22, 0.0  ;;  %v2386_v53 = vmul.f32 0.01, %v2376_v22  ;;  %v2631_v34 = vld [vmem:[%s4833_s19 + $0x8] sm:$0xff]  ;;  %v2867_v37 = vld [vmem:[%s4832_s18] ss:$0 sm:$0xff] }
 0xb0c   :  { %v2391_v52 = vadd.f32 %v2389_v39, %v4221_v5  ;;  %s2722_s19 = sshll.u32 %s3517_s8, 4  ;;  %s2723_s19 = int_to_ptr.vmem [resolvable:$true] %s2722_s19 }
 0xb0d   :  { %v2388_v51 = vsel %vm2384_vm13, %v2376_v22, %v2386_v53  ;;  %s3489_s29 = scalar_lea.vmem %s2723_s19, 32  ;;  %p3494_p1 = scmp.lt.s32.totalorder %s2723_s19, %s2723_s19 }
 0xb0e   :  { %v2421_v54 = vsel %vm465_vm4, %v2391_v52, 0.0  ;;  %v2428_v55 = vsel %vm465_vm4, %v2391_v52, -inf  ;;  %v2390_v32 = vadd.f32 %v2388_v51, %v4226_v7  ;;  %v2453_v7 = vld [vmem:[%s4829_s15 + $0x28] sm:$0xff]  ;;  %v2869_v51 = vld [vmem:[%s4834_s20] ss:$0 sm:$0xff]  ;;  %p3490_p0 = scmp.ne.s32.totalorder %s2723_s19, %s3489_s29  ;;  %p3495_p2 = scmp.lt.s32.totalorder %s3489_s29, %s3489_s29 }
 0xb0f   :  { %v2422_v57 = vrot.slane %v2421_v54, 4  ;;  %v2429_v46 = vrot.slane %v2428_v55, 4  ;;  %3413 = vmatpush3.msra.mxu1 %v2453_v7 }
 0xb10   :  { %v2392_v59 = vsel %vm465_vm4, %v2390_v32, 0.0  ;;  %v2399_v47 = vsel %vm465_vm4, %v2390_v32, -inf  ;;  %3414 = vmatprep.subr.mxu1 %v3511_v10  ;;  %vm3516_vm4 = vmmov 0   ;;  %p3496_p3 = por %p3495_p2, %p3494_p1 }
 0xb11   :  { %v2423_v60 = vadd.f32 %v2422_v57, %v2421_v54  ;;  %v2393_v62 = vrot.slane %v2392_v59, 4  ;;  %v2400_v5 = vrot.slane %v2399_v47, 4  ;;  %v2430_v0 = vmax.f32 %v2428_v55, %v2429_v46  ;;  %3415 = vmatpush3.msra.mxu1 %v2452_v48  ;;  %3424 = vmatprep.mubr.msk.f32.mxu1 %vm3516_vm4, %v3511_v10 }
 0xb12   :  { %3416 = vmatprep.subr.mxu1 %v3511_v10  ;;  %3439 = vmatprep.mubr.msk.f32.mxu0 %vm3516_vm4, %v3511_v10  ;;  %p3497_p4 = pnand %p3496_p3, %p3490_p0 }
 0xb13   :  { %v2394_v1 = vadd.f32 %v2393_v62, %v2392_v59  ;;  %v2424_v2 = vrot.slane %v2423_v60, 2  ;;  %v2431_v3 = vrot.slane %v2430_v0, 2  ;;  %v2401_v4 = vmax.f32 %v2399_v47, %v2400_v5  ;;  %3417 = vmatpush3.msra.mxu1 %v2451_v9 }
 0xb14   :  { %3418 = vmatprep.subr.mxu1 %v3511_v10 }
 0xb15   :  { %v2425_v29 = vadd.f32 %v2424_v2, %v2423_v60  ;;  %v2395_v12 = vrot.slane %v2394_v1, 2  ;;  %v2402_v8 = vrot.slane %v2401_v4, 2  ;;  %v2432_v15 = vmax.f32 %v2430_v0, %v2431_v3  ;;  %3419 = vmatpush3.msra.mxu1 %v2450_v58 }
 0xb16   :  { %3420 = vmatprep.subr.mxu1 %v3511_v10 }
 0xb17   :  { %v2426_v11 = vrot.slane %v2425_v29, 1  ;;  %v2396_v14 = vadd.f32 %v2395_v12, %v2394_v1  ;;  %v2403_v35 = vmax.f32 %v2401_v4, %v2402_v8  ;;  %v2433_v18 = vrot.slane %v2432_v15, 1  ;;  %3421 = vmatpush3.msra.mxu1 %v2449_v38 }
 0xb18   :  { %3422 = vmatprep.subr.mxu1 %v3511_v10 }
 0xb19   :  { %v2427_v16 = vadd.f32 %v2426_v11, %v2425_v29  ;;  %v2397_v63 = vrot.slane %v2396_v14, 1  ;;  %v2404_v13 = vrot.slane %v2403_v35, 1  ;;  %3423 = vmatpush3.msra.mxu1 %v2448_v17  ;;  %v2434_v6 = vmax.f32 %v2432_v15, %v2433_v18 }
 0xb1b   :  { %v2436_v61 = vmul.f32 0.125, %v2427_v16  ;;  %v2398_v40 = vadd.f32 %v2397_v63, %v2396_v14  ;;  %2435 = vst.msk [vmem:[#allocation4 + $0x1] sm:$0x1] %vm2406_vm14, %v2427_v16  ;;  %v2405_v20 = vmax.f32 %v2403_v35, %v2404_v13 }
 0xb1d   :  { %2438 = vrot.lane.b32.xlu0 %v2436_v61, %s3513_s28  ;;  %v2408_v41 = vmul.f32 0.125, %v2398_v40  ;;  %2407 = vst.msk [vmem:[#allocation4] sm:$0x1] %vm2406_vm14, %v2398_v40 }
 0xb1f   :  { %2410 = vrot.lane.b32.xlu1 %v2408_v41, %s3513_s28 }
 0xb21   :  { %2443 = vrot.lane.b32.xlu0 %v2434_v6, %s3512_s25 }
 0xb23   :  { %2416 = vrot.lane.b32.xlu1 %v2405_v20, %s3512_s25 }
 0xb8f   :  { %v2439_v21 = vpop.permute.xlu0 %2438 }
 0xb90   :  { %2441 = vst.msk [vmem:[#allocation4 + $0x1] sm:$0x1] %vm2413_vm15, %v2439_v21 }
 0xb91   :  { %v2411_v23 = vpop.permute.xlu1 %2410 }
 0xb92   :  { %2414 = vst.msk [vmem:[#allocation4] sm:$0x1] %vm2413_vm15, %v2411_v23 }
 0xb93   :  { %v2444_v24 = vpop.permute.xlu0 %2443 }
 0xb94   :  { %2446 = vst.msk [vmem:[#allocation4 + $0x1] sm:$0x1] %vm2419_vm0, %v2444_v24 }
 0xb95   :  { %v2417_v25 = vpop.permute.xlu1 %2416 }
 0xb96   :  { %2420 = vst.msk [vmem:[#allocation4] sm:$0x1] %vm2419_vm0, %v2417_v25 }
 0xb9d   :  { %v2447_v26 = vld [vmem:[#allocation4] sm:$0x3] }
 0xb9e   :  { %3425 = vmatmul.mubr.f32.vlgmr.msra.gmra.mxu1 %v2447_v26 }
 0xc5e   :  { %v2537_v50 = vpop.f32.mrf.mxu1 }
 0xc5f   :  { %v2538_v30 = vadd.f32 %v2866_v28, %v2537_v50 }
 0xc60   :  { %v3426_v27 = vpop.f32.mrf.mxu1 }
 0xc61   :  { %v2541_v31 = vmax.f32 %v2538_v30, 0.0 }
 0xc63   :  { %3440 = vmatmul.mubr.msk.f32.vlgmr.msra.gmra.mxu0 %vm2555_vm1, %v2541_v31 }
 0xc64   :  { %3448 = vmatprep.mubr.msk.f32.mxu0 %vm3516_vm4, %v3511_v10  ;;  %3443 = vmatpush3.msra.mxu0 %v2632_v33 }
 0xc65   :  { %3444 = vmatprep.subr.mxu0 %v3511_v10 }
 0xc66   :  { %3445 = vmatpush3.msra.mxu0 %v2631_v34 }
 0xc67   :  { %3446 = vmatprep.subr.mxu0 %v3511_v10 }
 0xc68   :  { %3447 = vmatpush3.msra.mxu0 %v2630_v45 }
 0xd23   :  { %v2625_v22 = vpop.f32.mrf.mxu0 }
 0xd24   :  { %v2626_v39 = vadd.f32 %v2867_v37, %v2625_v22 }
 0xd25   :  { %v3441_v53 = vpop.f32.mrf.mxu0 }
 0xd26   :  { %v2629_v52 = vmax.f32 %v2626_v39, 0.0 }
 0xd28   :  { %3449 = vmatmul.mubr.msk.f32.vlgmr.msra.gmra.mxu0 %vm2640_vm2, %v2629_v52 }
 0xde8   :  { %v2710_v54 = vpop.f32.mrf.mxu0 }
 0xde9   :  { %v2711_v10 = vadd.f32 %v2869_v51, %v2710_v54 }
 0xdea   :  { %v3450_v55 = vpop.f32.mrf.mxu0 }
 0xdeb   :  { %2715 = vst.msk [vmem:[#allocation5] sm:$0x3] %vm2714_vm5, %v2711_v10 }
 0xdec   :  { %3500 = shalt.err (!%p3497_p4)
}
 0xded   :  { %2725 = dma.vmem_to_hbm [thread:$0]  %s2723_s19, 32, %s4835_s21, [#allocation6]  }
 0xdee   :  { %3509 = dma.done.wait [#allocation6], 32  }
 0xdef   :  { %3510 = vsyncadd [#allocation6], 4294967264 }
 0xdf0   :  { %2729 = vsyncpa [#allocation6], 1 }

</bundles_post_ra>
